<compile_context>
chip_gen: v7x
topology: tpu7x:2x2x1
jax: 0.10.0
libtpu: 0.0.40
codegen_flags: <defaults>
</compile_context>

<pallas_src>
import math
import functools

import jax
import jax.numpy as jnp
from jax import lax
from jax.experimental import pallas as pl
from jax.experimental.pallas import tpu as pltpu


# -----------------------------------------------------------------------------
# Generation-aware helper: how many TensorCores share one chip.
# -----------------------------------------------------------------------------
def _tensorcores_per_chip():
    """Best-effort detection: 2 on v7x, 1 on v5e/v6e (safe fallback: 1)."""
    try:
        kind = jax.devices()[0].device_kind.lower()
    except Exception:
        return 1
    return 2 if ("v7" in kind or "7x" in kind) else 1


# -----------------------------------------------------------------------------
# Fused kernel: one grid step == `batch_block` batch elements.
# -----------------------------------------------------------------------------
def _fused_cross_attention_kernel(*refs, n_heads, head_dim, scale,
                                  with_mask, batch_block):
    if with_mask:
        (x_ref, y_ref, wq_ref, bq_ref, wkv_ref, bkv_ref, wo_ref, bo_ref,
         mask_ref, o_ref, attn_sc) = refs
    else:
        (x_ref, y_ref, wq_ref, bq_ref, wkv_ref, bkv_ref, wo_ref, bo_ref,
         o_ref, attn_sc) = refs
        mask_ref = None

    hidden = n_heads * head_dim

    for b in range(batch_block):                     # static, tiny trip count
        x = x_ref[b]                                 # [T, query_dim]
        y = y_ref[b]                                 # [S, cross_dim]

        # Projections (MXU, f32 accumulation). K and V share one fused matmul.
        # Softmax scale applied once to q here (not per-head on [T,S] scores).
        q = (jnp.dot(x, wq_ref[...], preferred_element_type=jnp.float32)
             + bq_ref[...]) * scale                  # [T, hidden]
        kv = (jnp.dot(y, wkv_ref[...], preferred_element_type=jnp.float32)
              + bkv_ref[...])                        # [S, 2*hidden]

        if with_mask:
            m = mask_ref[b, 0]                       # [T, S]

        # Per-head attention. Each head's output is written into its lane
        # slice of the [T, hidden] VMEM accumulator; the output projection is
        # then a SINGLE K=hidden matmul instead of n_heads K=head_dim ones.
        for h in range(n_heads):
            lo = h * head_dim
            q_h = q[:, lo:lo + head_dim]                     # [T, Dh]
            k_h = kv[:, lo:lo + head_dim]                    # [S, Dh]
            v_h = kv[:, hidden + lo:hidden + lo + head_dim]  # [S, Dh]

            # q_h @ k_h^T without materializing a transpose (contract Dh).
            s = lax.dot_general(q_h, k_h, (((1,), (1,)), ((), ())),
                                preferred_element_type=jnp.float32)  # [T, S]
            if with_mask:
                s = s + m

            s = s - jnp.max(s, axis=-1, keepdims=True)
            e = jnp.exp(s)
            # Deferred normalization: scale the [T, Dh] result, not [T, S].
            inv = pl.reciprocal(jnp.sum(e, axis=-1, keepdims=True),
                                approx=False)                # [T, 1]
            o_h = jnp.dot(e, v_h,
                          preferred_element_type=jnp.float32) * inv  # [T, Dh]
            attn_sc[:, lo:lo + head_dim] = o_h

        out = (jnp.dot(attn_sc[...], wo_ref[...],
                       preferred_element_type=jnp.float32)
               + bo_ref[...])                         # [T, output_dim]
        o_ref[b] = out.astype(o_ref.dtype)


# -----------------------------------------------------------------------------
# One-time parameter fusion (hoisted out of the per-call forward path).
# -----------------------------------------------------------------------------
def fuse_cross_attention_params(params):
    return {
        "wq": params["wq"], "bq": params["bq"],
        "wkv": jnp.concatenate([params["wk"], params["wv"]], axis=1),
        "bkv": jnp.concatenate([params["bk"], params["bv"]], axis=1),
        "wo": params["wo"], "bo": params["bo"],
    }


# -----------------------------------------------------------------------------
# Forward wrapper (single pallas_call; everything VMEM-resident).
# -----------------------------------------------------------------------------
def cross_attention_forward(fused, x, y, n_heads, head_dim, mask=None):
    B, T, query_dim = x.shape
    S, cross_dim = y.shape[1], y.shape[2]
    hidden = fused["wq"].shape[1]
    output_dim = fused["wo"].shape[1]
    with_mask = mask is not None
    scale = 1.0 / math.sqrt(head_dim)

    # Grid = one step per TensorCore (collapse batch on 1-TC chips, 2-way
    # "parallel" split on v7x).  n_blocks always divides B.
    n_blocks = max(1, min(B, _tensorcores_per_chip()))
    while B % n_blocks:
        n_blocks -= 1
    bpb = B // n_blocks

    kernel = functools.partial(
        _fused_cross_attention_kernel,
        n_heads=n_heads, head_dim=head_dim, scale=scale,
        with_mask=with_mask, batch_block=bpb)

    in_specs = [
        pl.BlockSpec((bpb, T, query_dim), lambda b: (b, 0, 0)),
        pl.BlockSpec((bpb, S, cross_dim), lambda b: (b, 0, 0)),
        pl.BlockSpec((query_dim, hidden), lambda b: (0, 0)),
        pl.BlockSpec((1, hidden), lambda b: (0, 0)),
        pl.BlockSpec((cross_dim, 2 * hidden), lambda b: (0, 0)),
        pl.BlockSpec((1, 2 * hidden), lambda b: (0, 0)),
        pl.BlockSpec((hidden, output_dim), lambda b: (0, 0)),
        pl.BlockSpec((1, output_dim), lambda b: (0, 0)),
    ]
    args = [x, y, fused["wq"], fused["bq"], fused["wkv"], fused["bkv"],
            fused["wo"], fused["bo"]]
    if with_mask:
        in_specs.append(pl.BlockSpec((bpb, 1, T, S), lambda b: (b, 0, 0, 0)))
        args.append(mask)

    out = pl.pallas_call(
        kernel,
        out_shape=jax.ShapeDtypeStruct((B, T, output_dim), jnp.float32),
        grid_spec=pltpu.PrefetchScalarGridSpec(
            num_scalar_prefetch=0,
            grid=(n_blocks,),
            in_specs=in_specs,
            out_specs=pl.BlockSpec((bpb, T, output_dim), lambda b: (b, 0, 0)),
            scratch_shapes=[pltpu.VMEM((T, hidden), jnp.float32)],
        ),
        compiler_params=pltpu.CompilerParams(
            dimension_semantics=("parallel",)),
    )(*args)
    return out


# -----------------------------------------------------------------------------
# Pure-JAX reference for validation.
# -----------------------------------------------------------------------------
def cross_attention_reference(params, x, y, n_heads, head_dim, mask=None):
    B, T, _ = x.shape
    S = y.shape[1]
    q = x @ params["wq"] + params["bq"]
    k = y @ params["wk"] + params["bk"]
    v = y @ params["wv"] + params["bv"]
    q = q.reshape(B, T, n_heads, head_dim).transpose(0, 2, 1, 3)
    k = k.reshape(B, S, n_heads, head_dim).transpose(0, 2, 1, 3)
    v = v.reshape(B, S, n_heads, head_dim).transpose(0, 2, 1, 3)
    if mask is None:
        mask = jnp.zeros((B, 1, T, S), dtype=jnp.float32)
    scale = 1.0 / math.sqrt(head_dim)
    s = jnp.einsum("bhtd,bhsd->bhts", q, k) * scale + mask
    p = jax.nn.softmax(s, axis=-1)
    o = jnp.einsum("bhts,bhsd->bhtd", p, v)
    o = o.transpose(0, 2, 1, 3).reshape(B, T, -1)
    return o @ params["wo"] + params["bo"]


if __name__ == "__main__":
    # Small shapes consistent with the module.
    B, T, S = 2, 8, 16
    query_dim, cross_dim = 32, 48
    hidden_dim, output_dim = 32, 32
    n_heads, head_dim = 4, 8  # n_heads * head_dim == hidden_dim

    key = jax.random.PRNGKey(0)
    keys = jax.random.split(key, 11)

    # Deterministic synthetic parameters (nn.Linear weight [out,in] -> stored [in,out]).
    params = {
        "wq": jax.random.normal(keys[0], (query_dim, hidden_dim), jnp.float32) * 0.05,
        "bq": jax.random.normal(keys[1], (1, hidden_dim), jnp.float32) * 0.01,
        "wk": jax.random.normal(keys[2], (cross_dim, hidden_dim), jnp.float32) * 0.05,
        "bk": jax.random.normal(keys[3], (1, hidden_dim), jnp.float32) * 0.01,
        "wv": jax.random.normal(keys[4], (cross_dim, hidden_dim), jnp.float32) * 0.05,
        "bv": jax.random.normal(keys[5], (1, hidden_dim), jnp.float32) * 0.01,
        "wo": jax.random.normal(keys[6], (hidden_dim, output_dim), jnp.float32) * 0.05,
        "bo": jax.random.normal(keys[7], (1, output_dim), jnp.float32) * 0.01,
    }

    x = jax.random.normal(keys[8], (B, T, query_dim), jnp.float32)
    y = jax.random.normal(keys[9], (B, S, cross_dim), jnp.float32)
    mask = jax.random.normal(keys[10], (B, 1, T, S), jnp.float32)

    # Fuse K/V weights once (hoisted out of the per-call forward path).
    fused = fuse_cross_attention_params(params)

    # Case 1: mask=None (kernel specialization skips mask load/add entirely).
    out = cross_attention_forward(fused, x, y, n_heads, head_dim, mask=None)
    out = jax.block_until_ready(out)
    ref = cross_attention_reference(params, x, y, n_heads, head_dim, mask=None)
    assert out.shape == (B, T, output_dim), out.shape
    assert jnp.allclose(out, ref, atol=1e-4, rtol=1e-4), (
        "no-mask mismatch vs reference: max abs err "
        f"{float(jnp.max(jnp.abs(out - ref)))}"
    )

    # Case 2: explicit additive mask.
    out_m = cross_attention_forward(fused, x, y, n_heads, head_dim, mask=mask)
    out_m = jax.block_until_ready(out_m)
    ref_m = cross_attention_reference(params, x, y, n_heads, head_dim, mask=mask)
    assert jnp.allclose(out_m, ref_m, atol=1e-4, rtol=1e-4), (
        "masked mismatch vs reference: max abs err "
        f"{float(jnp.max(jnp.abs(out_m - ref_m)))}"
    )

    print("KERNEL_OK")
</pallas_src>

<mosaic_0001>
module attributes {stable_mosaic.version = 11 : i64} {
  func.func @_fused_cross_attention_kernel(%arg0: i32, %arg1: memref<2x8x32xf32, #tpu.memory_space<vmem>>, %arg2: memref<2x16x48xf32, #tpu.memory_space<vmem>>, %arg3: memref<32x32xf32, #tpu.memory_space<vmem>>, %arg4: memref<1x32xf32, #tpu.memory_space<vmem>>, %arg5: memref<48x64xf32, #tpu.memory_space<vmem>>, %arg6: memref<1x64xf32, #tpu.memory_space<vmem>>, %arg7: memref<32x32xf32, #tpu.memory_space<vmem>>, %arg8: memref<1x32xf32, #tpu.memory_space<vmem>>, %arg9: memref<2x8x32xf32, #tpu.memory_space<vmem>>, %arg10: memref<8x32xf32, #tpu.memory_space<vmem>>) attributes {dimension_semantics = [#tpu.dimension_semantics<parallel>], iteration_bounds = array<i64: 1>, scalar_prefetch = 0 : i64, scratch_operands = 1 : i64, tpu.core_type = #tpu.core_type<tc>, window_params = [{transform_indices = @transform_0, window_bounds = array<i64: 2, 8, 32>}, {transform_indices = @transform_1, window_bounds = array<i64: 2, 16, 48>}, {pipeline_mode = #tpu.pipeline_mode<synchronous>, transform_indices = @transform_2, window_bounds = array<i64: 32, 32>}, {pipeline_mode = #tpu.pipeline_mode<synchronous>, transform_indices = @transform_3, window_bounds = array<i64: 1, 32>}, {pipeline_mode = #tpu.pipeline_mode<synchronous>, transform_indices = @transform_4, window_bounds = array<i64: 48, 64>}, {pipeline_mode = #tpu.pipeline_mode<synchronous>, transform_indices = @transform_5, window_bounds = array<i64: 1, 64>}, {pipeline_mode = #tpu.pipeline_mode<synchronous>, transform_indices = @transform_6, window_bounds = array<i64: 32, 32>}, {pipeline_mode = #tpu.pipeline_mode<synchronous>, transform_indices = @transform_7, window_bounds = array<i64: 1, 32>}, {transform_indices = @transform_8, window_bounds = array<i64: 2, 8, 32>}]} {
    %c0 = arith.constant 0 : index
    %c0_0 = arith.constant 0 : index
    %c0_1 = arith.constant 0 : index
    %0 = vector.load %arg1[%c0, %c0_0, %c0_1] : memref<2x8x32xf32, #tpu.memory_space<vmem>>, vector<1x8x32xf32>
    %1 = vector.shape_cast %0 : vector<1x8x32xf32> to vector<8x32xf32>
    %c0_2 = arith.constant 0 : index
    %c0_3 = arith.constant 0 : index
    %c0_4 = arith.constant 0 : index
    %2 = vector.load %arg2[%c0_2, %c0_3, %c0_4] : memref<2x16x48xf32, #tpu.memory_space<vmem>>, vector<1x16x48xf32>
    %3 = vector.shape_cast %2 : vector<1x16x48xf32> to vector<16x48xf32>
    %c0_5 = arith.constant 0 : index
    %c0_6 = arith.constant 0 : index
    %4 = vector.load %arg3[%c0_5, %c0_6] : memref<32x32xf32, #tpu.memory_space<vmem>>, vector<32x32xf32>
    %cst = arith.constant dense<0.000000e+00> : vector<8x32xf32>
    %5 = tpu.matmul %1, %4, %cst {dimension_numbers = #tpu.dot_dimension_numbers<[1], [0], [0], [1], [0, 0, 1, 1], [], []>} : vector<8x32xf32>, vector<32x32xf32>, vector<8x32xf32> -> vector<8x32xf32>
    %c0_7 = arith.constant 0 : index
    %c0_8 = arith.constant 0 : index
    %6 = vector.load %arg4[%c0_7, %c0_8] : memref<1x32xf32, #tpu.memory_space<vmem>>, vector<1x32xf32>
    %7 = vector.broadcast %6 : vector<1x32xf32> to vector<8x32xf32>
    %8 = arith.addf %5, %7 : vector<8x32xf32>
    %cst_9 = arith.constant 0.353553385 : f32
    %9 = vector.broadcast %cst_9 : f32 to vector<8x32xf32>
    %10 = arith.mulf %8, %9 : vector<8x32xf32>
    %c0_10 = arith.constant 0 : index
    %c0_11 = arith.constant 0 : index
    %11 = vector.load %arg5[%c0_10, %c0_11] : memref<48x64xf32, #tpu.memory_space<vmem>>, vector<48x64xf32>
    %cst_12 = arith.constant dense<0.000000e+00> : vector<16x64xf32>
    %12 = tpu.matmul %3, %11, %cst_12 {dimension_numbers = #tpu.dot_dimension_numbers<[1], [0], [0], [1], [0, 0, 1, 1], [], []>} : vector<16x48xf32>, vector<48x64xf32>, vector<16x64xf32> -> vector<16x64xf32>
    %c0_13 = arith.constant 0 : index
    %c0_14 = arith.constant 0 : index
    %13 = vector.load %arg6[%c0_13, %c0_14] : memref<1x64xf32, #tpu.memory_space<vmem>>, vector<1x64xf32>
    %14 = vector.broadcast %13 : vector<1x64xf32> to vector<16x64xf32>
    %15 = arith.addf %12, %14 : vector<16x64xf32>
    %16 = vector.extract_strided_slice %10 {offsets = [0, 0], sizes = [8, 8], strides = [1, 1]} : vector<8x32xf32> to vector<8x8xf32>
    %17 = vector.extract_strided_slice %15 {offsets = [0, 0], sizes = [16, 8], strides = [1, 1]} : vector<16x64xf32> to vector<16x8xf32>
    %18 = vector.extract_strided_slice %15 {offsets = [0, 32], sizes = [16, 8], strides = [1, 1]} : vector<16x64xf32> to vector<16x8xf32>
    %cst_15 = arith.constant dense<0.000000e+00> : vector<8x16xf32>
    %19 = tpu.matmul %16, %17, %cst_15 {dimension_numbers = #tpu.dot_dimension_numbers<[1], [1], [0], [0], [0, 0, 1, 0], [], []>} : vector<8x8xf32>, vector<16x8xf32>, vector<8x16xf32> -> vector<8x16xf32>
    %cst_16 = arith.constant dense<0xFF800000> : vector<8xf32>
    %20 = vector.multi_reduction <maximumf>, %19, %cst_16 [1] : vector<8x16xf32> to vector<8xf32>
    %21 = vector.shape_cast %20 : vector<8xf32> to vector<8x1xf32>
    %22 = vector.broadcast %21 : vector<8x1xf32> to vector<8x16xf32>
    %23 = arith.subf %19, %22 : vector<8x16xf32>
    %24 = math.exp %23 : vector<8x16xf32>
    %cst_17 = arith.constant dense<0.000000e+00> : vector<8xf32>
    %25 = vector.multi_reduction <add>, %24, %cst_17 [1] : vector<8x16xf32> to vector<8xf32>
    %26 = vector.shape_cast %25 : vector<8xf32> to vector<8x1xf32>
    %27 = tpu.reciprocal %26 : vector<8x1xf32> -> vector<8x1xf32>
    %cst_18 = arith.constant dense<0.000000e+00> : vector<8x8xf32>
    %28 = tpu.matmul %24, %18, %cst_18 {dimension_numbers = #tpu.dot_dimension_numbers<[1], [0], [0], [1], [0, 0, 1, 1], [], []>} : vector<8x16xf32>, vector<16x8xf32>, vector<8x8xf32> -> vector<8x8xf32>
    %29 = vector.broadcast %27 : vector<8x1xf32> to vector<8x8xf32>
    %30 = arith.mulf %28, %29 : vector<8x8xf32>
    %c0_19 = arith.constant 0 : index
    %c0_20 = arith.constant 0 : index
    %31 = vector.load %arg10[%c0_19, %c0_20] : memref<8x32xf32, #tpu.memory_space<vmem>>, vector<8x8xf32>
    tpu.vector_store %arg10[%c0_19, %c0_20], %30 {strides = array<i32>} : memref<8x32xf32, #tpu.memory_space<vmem>>, vector<8x8xf32>,
    %32 = vector.extract_strided_slice %10 {offsets = [0, 8], sizes = [8, 8], strides = [1, 1]} : vector<8x32xf32> to vector<8x8xf32>
    %33 = vector.extract_strided_slice %15 {offsets = [0, 8], sizes = [16, 8], strides = [1, 1]} : vector<16x64xf32> to vector<16x8xf32>
    %34 = vector.extract_strided_slice %15 {offsets = [0, 40], sizes = [16, 8], strides = [1, 1]} : vector<16x64xf32> to vector<16x8xf32>
    %cst_21 = arith.constant dense<0.000000e+00> : vector<8x16xf32>
    %35 = tpu.matmul %32, %33, %cst_21 {dimension_numbers = #tpu.dot_dimension_numbers<[1], [1], [0], [0], [0, 0, 1, 0], [], []>} : vector<8x8xf32>, vector<16x8xf32>, vector<8x16xf32> -> vector<8x16xf32>
    %cst_22 = arith.constant dense<0xFF800000> : vector<8xf32>
    %36 = vector.multi_reduction <maximumf>, %35, %cst_22 [1] : vector<8x16xf32> to vector<8xf32>
    %37 = vector.shape_cast %36 : vector<8xf32> to vector<8x1xf32>
    %38 = vector.broadcast %37 : vector<8x1xf32> to vector<8x16xf32>
    %39 = arith.subf %35, %38 : vector<8x16xf32>
    %40 = math.exp %39 : vector<8x16xf32>
    %cst_23 = arith.constant dense<0.000000e+00> : vector<8xf32>
    %41 = vector.multi_reduction <add>, %40, %cst_23 [1] : vector<8x16xf32> to vector<8xf32>
    %42 = vector.shape_cast %41 : vector<8xf32> to vector<8x1xf32>
    %43 = tpu.reciprocal %42 : vector<8x1xf32> -> vector<8x1xf32>
    %cst_24 = arith.constant dense<0.000000e+00> : vector<8x8xf32>
    %44 = tpu.matmul %40, %34, %cst_24 {dimension_numbers = #tpu.dot_dimension_numbers<[1], [0], [0], [1], [0, 0, 1, 1], [], []>} : vector<8x16xf32>, vector<16x8xf32>, vector<8x8xf32> -> vector<8x8xf32>
    %45 = vector.broadcast %43 : vector<8x1xf32> to vector<8x8xf32>
    %46 = arith.mulf %44, %45 : vector<8x8xf32>
    %c0_25 = arith.constant 0 : index
    %c8 = arith.constant 8 : index
    %47 = vector.load %arg10[%c0_25, %c8] : memref<8x32xf32, #tpu.memory_space<vmem>>, vector<8x8xf32>
    tpu.vector_store %arg10[%c0_25, %c8], %46 {strides = array<i32>} : memref<8x32xf32, #tpu.memory_space<vmem>>, vector<8x8xf32>,
    %48 = vector.extract_strided_slice %10 {offsets = [0, 16], sizes = [8, 8], strides = [1, 1]} : vector<8x32xf32> to vector<8x8xf32>
    %49 = vector.extract_strided_slice %15 {offsets = [0, 16], sizes = [16, 8], strides = [1, 1]} : vector<16x64xf32> to vector<16x8xf32>
    %50 = vector.extract_strided_slice %15 {offsets = [0, 48], sizes = [16, 8], strides = [1, 1]} : vector<16x64xf32> to vector<16x8xf32>
    %cst_26 = arith.constant dense<0.000000e+00> : vector<8x16xf32>
    %51 = tpu.matmul %48, %49, %cst_26 {dimension_numbers = #tpu.dot_dimension_numbers<[1], [1], [0], [0], [0, 0, 1, 0], [], []>} : vector<8x8xf32>, vector<16x8xf32>, vector<8x16xf32> -> vector<8x16xf32>
    %cst_27 = arith.constant dense<0xFF800000> : vector<8xf32>
    %52 = vector.multi_reduction <maximumf>, %51, %cst_27 [1] : vector<8x16xf32> to vector<8xf32>
    %53 = vector.shape_cast %52 : vector<8xf32> to vector<8x1xf32>
    %54 = vector.broadcast %53 : vector<8x1xf32> to vector<8x16xf32>
    %55 = arith.subf %51, %54 : vector<8x16xf32>
    %56 = math.exp %55 : vector<8x16xf32>
    %cst_28 = arith.constant dense<0.000000e+00> : vector<8xf32>
    %57 = vector.multi_reduction <add>, %56, %cst_28 [1] : vector<8x16xf32> to vector<8xf32>
    %58 = vector.shape_cast %57 : vector<8xf32> to vector<8x1xf32>
    %59 = tpu.reciprocal %58 : vector<8x1xf32> -> vector<8x1xf32>
    %cst_29 = arith.constant dense<0.000000e+00> : vector<8x8xf32>
    %60 = tpu.matmul %56, %50, %cst_29 {dimension_numbers = #tpu.dot_dimension_numbers<[1], [0], [0], [1], [0, 0, 1, 1], [], []>} : vector<8x16xf32>, vector<16x8xf32>, vector<8x8xf32> -> vector<8x8xf32>
    %61 = vector.broadcast %59 : vector<8x1xf32> to vector<8x8xf32>
    %62 = arith.mulf %60, %61 : vector<8x8xf32>
    %c0_30 = arith.constant 0 : index
    %c16 = arith.constant 16 : index
    %63 = vector.load %arg10[%c0_30, %c16] : memref<8x32xf32, #tpu.memory_space<vmem>>, vector<8x8xf32>
    tpu.vector_store %arg10[%c0_30, %c16], %62 {strides = array<i32>} : memref<8x32xf32, #tpu.memory_space<vmem>>, vector<8x8xf32>,
    %64 = vector.extract_strided_slice %10 {offsets = [0, 24], sizes = [8, 8], strides = [1, 1]} : vector<8x32xf32> to vector<8x8xf32>
    %65 = vector.extract_strided_slice %15 {offsets = [0, 24], sizes = [16, 8], strides = [1, 1]} : vector<16x64xf32> to vector<16x8xf32>
    %66 = vector.extract_strided_slice %15 {offsets = [0, 56], sizes = [16, 8], strides = [1, 1]} : vector<16x64xf32> to vector<16x8xf32>
    %cst_31 = arith.constant dense<0.000000e+00> : vector<8x16xf32>
    %67 = tpu.matmul %64, %65, %cst_31 {dimension_numbers = #tpu.dot_dimension_numbers<[1], [1], [0], [0], [0, 0, 1, 0], [], []>} : vector<8x8xf32>, vector<16x8xf32>, vector<8x16xf32> -> vector<8x16xf32>
    %cst_32 = arith.constant dense<0xFF800000> : vector<8xf32>
    %68 = vector.multi_reduction <maximumf>, %67, %cst_32 [1] : vector<8x16xf32> to vector<8xf32>
    %69 = vector.shape_cast %68 : vector<8xf32> to vector<8x1xf32>
    %70 = vector.broadcast %69 : vector<8x1xf32> to vector<8x16xf32>
    %71 = arith.subf %67, %70 : vector<8x16xf32>
    %72 = math.exp %71 : vector<8x16xf32>
    %cst_33 = arith.constant dense<0.000000e+00> : vector<8xf32>
    %73 = vector.multi_reduction <add>, %72, %cst_33 [1] : vector<8x16xf32> to vector<8xf32>
    %74 = vector.shape_cast %73 : vector<8xf32> to vector<8x1xf32>
    %75 = tpu.reciprocal %74 : vector<8x1xf32> -> vector<8x1xf32>
    %cst_34 = arith.constant dense<0.000000e+00> : vector<8x8xf32>
    %76 = tpu.matmul %72, %66, %cst_34 {dimension_numbers = #tpu.dot_dimension_numbers<[1], [0], [0], [1], [0, 0, 1, 1], [], []>} : vector<8x16xf32>, vector<16x8xf32>, vector<8x8xf32> -> vector<8x8xf32>
    %77 = vector.broadcast %75 : vector<8x1xf32> to vector<8x8xf32>
    %78 = arith.mulf %76, %77 : vector<8x8xf32>
    %c0_35 = arith.constant 0 : index
    %c24 = arith.constant 24 : index
    %79 = vector.load %arg10[%c0_35, %c24] : memref<8x32xf32, #tpu.memory_space<vmem>>, vector<8x8xf32>
    tpu.vector_store %arg10[%c0_35, %c24], %78 {strides = array<i32>} : memref<8x32xf32, #tpu.memory_space<vmem>>, vector<8x8xf32>,
    %c0_36 = arith.constant 0 : index
    %c0_37 = arith.constant 0 : index
    %80 = vector.load %arg10[%c0_36, %c0_37] : memref<8x32xf32, #tpu.memory_space<vmem>>, vector<8x32xf32>
    %c0_38 = arith.constant 0 : index
    %c0_39 = arith.constant 0 : index
    %81 = vector.load %arg7[%c0_38, %c0_39] : memref<32x32xf32, #tpu.memory_space<vmem>>, vector<32x32xf32>
    %cst_40 = arith.constant dense<0.000000e+00> : vector<8x32xf32>
    %82 = tpu.matmul %80, %81, %cst_40 {dimension_numbers = #tpu.dot_dimension_numbers<[1], [0], [0], [1], [0, 0, 1, 1], [], []>} : vector<8x32xf32>, vector<32x32xf32>, vector<8x32xf32> -> vector<8x32xf32>
    %c0_41 = arith.constant 0 : index
    %c0_42 = arith.constant 0 : index
    %83 = vector.load %arg8[%c0_41, %c0_42] : memref<1x32xf32, #tpu.memory_space<vmem>>, vector<1x32xf32>
    %84 = vector.broadcast %83 : vector<1x32xf32> to vector<8x32xf32>
    %85 = arith.addf %82, %84 : vector<8x32xf32>
    %c0_43 = arith.constant 0 : index
    %c0_44 = arith.constant 0 : index
    %c0_45 = arith.constant 0 : index
    %86 = vector.load %arg9[%c0_43, %c0_44, %c0_45] : memref<2x8x32xf32, #tpu.memory_space<vmem>>, vector<1x8x32xf32>
    %87 = vector.shape_cast %86 : vector<1x8x32xf32> to vector<8x32xf32>
    %88 = vector.shape_cast %85 : vector<8x32xf32> to vector<1x8x32xf32>
    tpu.vector_store %arg9[%c0_43, %c0_44, %c0_45], %88 {strides = array<i32>} : memref<2x8x32xf32, #tpu.memory_space<vmem>>, vector<1x8x32xf32>,
    %c1 = arith.constant 1 : index
    %c0_46 = arith.constant 0 : index
    %c0_47 = arith.constant 0 : index
    %89 = vector.load %arg1[%c1, %c0_46, %c0_47] : memref<2x8x32xf32, #tpu.memory_space<vmem>>, vector<1x8x32xf32>
    %90 = vector.shape_cast %89 : vector<1x8x32xf32> to vector<8x32xf32>
    %c1_48 = arith.constant 1 : index
    %c0_49 = arith.constant 0 : index
    %c0_50 = arith.constant 0 : index
    %91 = vector.load %arg2[%c1_48, %c0_49, %c0_50] : memref<2x16x48xf32, #tpu.memory_space<vmem>>, vector<1x16x48xf32>
    %92 = vector.shape_cast %91 : vector<1x16x48xf32> to vector<16x48xf32>
    %c0_51 = arith.constant 0 : index
    %c0_52 = arith.constant 0 : index
    %93 = vector.load %arg3[%c0_51, %c0_52] : memref<32x32xf32, #tpu.memory_space<vmem>>, vector<32x32xf32>
    %cst_53 = arith.constant dense<0.000000e+00> : vector<8x32xf32>
    %94 = tpu.matmul %90, %93, %cst_53 {dimension_numbers = #tpu.dot_dimension_numbers<[1], [0], [0], [1], [0, 0, 1, 1], [], []>} : vector<8x32xf32>, vector<32x32xf32>, vector<8x32xf32> -> vector<8x32xf32>
    %c0_54 = arith.constant 0 : index
    %c0_55 = arith.constant 0 : index
    %95 = vector.load %arg4[%c0_54, %c0_55] : memref<1x32xf32, #tpu.memory_space<vmem>>, vector<1x32xf32>
    %96 = vector.broadcast %95 : vector<1x32xf32> to vector<8x32xf32>
    %97 = arith.addf %94, %96 : vector<8x32xf32>
    %cst_56 = arith.constant 0.353553385 : f32
    %98 = vector.broadcast %cst_56 : f32 to vector<8x32xf32>
    %99 = arith.mulf %97, %98 : vector<8x32xf32>
    %c0_57 = arith.constant 0 : index
    %c0_58 = arith.constant 0 : index
    %100 = vector.load %arg5[%c0_57, %c0_58] : memref<48x64xf32, #tpu.memory_space<vmem>>, vector<48x64xf32>
    %cst_59 = arith.constant dense<0.000000e+00> : vector<16x64xf32>
    %101 = tpu.matmul %92, %100, %cst_59 {dimension_numbers = #tpu.dot_dimension_numbers<[1], [0], [0], [1], [0, 0, 1, 1], [], []>} : vector<16x48xf32>, vector<48x64xf32>, vector<16x64xf32> -> vector<16x64xf32>
    %c0_60 = arith.constant 0 : index
    %c0_61 = arith.constant 0 : index
    %102 = vector.load %arg6[%c0_60, %c0_61] : memref<1x64xf32, #tpu.memory_space<vmem>>, vector<1x64xf32>
    %103 = vector.broadcast %102 : vector<1x64xf32> to vector<16x64xf32>
    %104 = arith.addf %101, %103 : vector<16x64xf32>
    %105 = vector.extract_strided_slice %99 {offsets = [0, 0], sizes = [8, 8], strides = [1, 1]} : vector<8x32xf32> to vector<8x8xf32>
    %106 = vector.extract_strided_slice %104 {offsets = [0, 0], sizes = [16, 8], strides = [1, 1]} : vector<16x64xf32> to vector<16x8xf32>
    %107 = vector.extract_strided_slice %104 {offsets = [0, 32], sizes = [16, 8], strides = [1, 1]} : vector<16x64xf32> to vector<16x8xf32>
    %cst_62 = arith.constant dense<0.000000e+00> : vector<8x16xf32>
    %108 = tpu.matmul %105, %106, %cst_62 {dimension_numbers = #tpu.dot_dimension_numbers<[1], [1], [0], [0], [0, 0, 1, 0], [], []>} : vector<8x8xf32>, vector<16x8xf32>, vector<8x16xf32> -> vector<8x16xf32>
    %cst_63 = arith.constant dense<0xFF800000> : vector<8xf32>
    %109 = vector.multi_reduction <maximumf>, %108, %cst_63 [1] : vector<8x16xf32> to vector<8xf32>
    %110 = vector.shape_cast %109 : vector<8xf32> to vector<8x1xf32>
    %111 = vector.broadcast %110 : vector<8x1xf32> to vector<8x16xf32>
    %112 = arith.subf %108, %111 : vector<8x16xf32>
    %113 = math.exp %112 : vector<8x16xf32>
    %cst_64 = arith.constant dense<0.000000e+00> : vector<8xf32>
    %114 = vector.multi_reduction <add>, %113, %cst_64 [1] : vector<8x16xf32> to vector<8xf32>
    %115 = vector.shape_cast %114 : vector<8xf32> to vector<8x1xf32>
    %116 = tpu.reciprocal %115 : vector<8x1xf32> -> vector<8x1xf32>
    %cst_65 = arith.constant dense<0.000000e+00> : vector<8x8xf32>
    %117 = tpu.matmul %113, %107, %cst_65 {dimension_numbers = #tpu.dot_dimension_numbers<[1], [0], [0], [1], [0, 0, 1, 1], [], []>} : vector<8x16xf32>, vector<16x8xf32>, vector<8x8xf32> -> vector<8x8xf32>
    %118 = vector.broadcast %116 : vector<8x1xf32> to vector<8x8xf32>
    %119 = arith.mulf %117, %118 : vector<8x8xf32>
    %c0_66 = arith.constant 0 : index
    %c0_67 = arith.constant 0 : index
    %120 = vector.load %arg10[%c0_66, %c0_67] : memref<8x32xf32, #tpu.memory_space<vmem>>, vector<8x8xf32>
    tpu.vector_store %arg10[%c0_66, %c0_67], %119 {strides = array<i32>} : memref<8x32xf32, #tpu.memory_space<vmem>>, vector<8x8xf32>,
    %121 = vector.extract_strided_slice %99 {offsets = [0, 8], sizes = [8, 8], strides = [1, 1]} : vector<8x32xf32> to vector<8x8xf32>
    %122 = vector.extract_strided_slice %104 {offsets = [0, 8], sizes = [16, 8], strides = [1, 1]} : vector<16x64xf32> to vector<16x8xf32>
    %123 = vector.extract_strided_slice %104 {offsets = [0, 40], sizes = [16, 8], strides = [1, 1]} : vector<16x64xf32> to vector<16x8xf32>
    %cst_68 = arith.constant dense<0.000000e+00> : vector<8x16xf32>
    %124 = tpu.matmul %121, %122, %cst_68 {dimension_numbers = #tpu.dot_dimension_numbers<[1], [1], [0], [0], [0, 0, 1, 0], [], []>} : vector<8x8xf32>, vector<16x8xf32>, vector<8x16xf32> -> vector<8x16xf32>
    %cst_69 = arith.constant dense<0xFF800000> : vector<8xf32>
    %125 = vector.multi_reduction <maximumf>, %124, %cst_69 [1] : vector<8x16xf32> to vector<8xf32>
    %126 = vector.shape_cast %125 : vector<8xf32> to vector<8x1xf32>
    %127 = vector.broadcast %126 : vector<8x1xf32> to vector<8x16xf32>
    %128 = arith.subf %124, %127 : vector<8x16xf32>
    %129 = math.exp %128 : vector<8x16xf32>
    %cst_70 = arith.constant dense<0.000000e+00> : vector<8xf32>
    %130 = vector.multi_reduction <add>, %129, %cst_70 [1] : vector<8x16xf32> to vector<8xf32>
    %131 = vector.shape_cast %130 : vector<8xf32> to vector<8x1xf32>
    %132 = tpu.reciprocal %131 : vector<8x1xf32> -> vector<8x1xf32>
    %cst_71 = arith.constant dense<0.000000e+00> : vector<8x8xf32>
    %133 = tpu.matmul %129, %123, %cst_71 {dimension_numbers = #tpu.dot_dimension_numbers<[1], [0], [0], [1], [0, 0, 1, 1], [], []>} : vector<8x16xf32>, vector<16x8xf32>, vector<8x8xf32> -> vector<8x8xf32>
    %134 = vector.broadcast %132 : vector<8x1xf32> to vector<8x8xf32>
    %135 = arith.mulf %133, %134 : vector<8x8xf32>
    %c0_72 = arith.constant 0 : index
    %c8_73 = arith.constant 8 : index
    %136 = vector.load %arg10[%c0_72, %c8_73] : memref<8x32xf32, #tpu.memory_space<vmem>>, vector<8x8xf32>
    tpu.vector_store %arg10[%c0_72, %c8_73], %135 {strides = array<i32>} : memref<8x32xf32, #tpu.memory_space<vmem>>, vector<8x8xf32>,
    %137 = vector.extract_strided_slice %99 {offsets = [0, 16], sizes = [8, 8], strides = [1, 1]} : vector<8x32xf32> to vector<8x8xf32>
    %138 = vector.extract_strided_slice %104 {offsets = [0, 16], sizes = [16, 8], strides = [1, 1]} : vector<16x64xf32> to vector<16x8xf32>
    %139 = vector.extract_strided_slice %104 {offsets = [0, 48], sizes = [16, 8], strides = [1, 1]} : vector<16x64xf32> to vector<16x8xf32>
    %cst_74 = arith.constant dense<0.000000e+00> : vector<8x16xf32>
    %140 = tpu.matmul %137, %138, %cst_74 {dimension_numbers = #tpu.dot_dimension_numbers<[1], [1], [0], [0], [0, 0, 1, 0], [], []>} : vector<8x8xf32>, vector<16x8xf32>, vector<8x16xf32> -> vector<8x16xf32>
    %cst_75 = arith.constant dense<0xFF800000> : vector<8xf32>
    %141 = vector.multi_reduction <maximumf>, %140, %cst_75 [1] : vector<8x16xf32> to vector<8xf32>
    %142 = vector.shape_cast %141 : vector<8xf32> to vector<8x1xf32>
    %143 = vector.broadcast %142 : vector<8x1xf32> to vector<8x16xf32>
    %144 = arith.subf %140, %143 : vector<8x16xf32>
    %145 = math.exp %144 : vector<8x16xf32>
    %cst_76 = arith.constant dense<0.000000e+00> : vector<8xf32>
    %146 = vector.multi_reduction <add>, %145, %cst_76 [1] : vector<8x16xf32> to vector<8xf32>
    %147 = vector.shape_cast %146 : vector<8xf32> to vector<8x1xf32>
    %148 = tpu.reciprocal %147 : vector<8x1xf32> -> vector<8x1xf32>
    %cst_77 = arith.constant dense<0.000000e+00> : vector<8x8xf32>
    %149 = tpu.matmul %145, %139, %cst_77 {dimension_numbers = #tpu.dot_dimension_numbers<[1], [0], [0], [1], [0, 0, 1, 1], [], []>} : vector<8x16xf32>, vector<16x8xf32>, vector<8x8xf32> -> vector<8x8xf32>
    %150 = vector.broadcast %148 : vector<8x1xf32> to vector<8x8xf32>
    %151 = arith.mulf %149, %150 : vector<8x8xf32>
    %c0_78 = arith.constant 0 : index
    %c16_79 = arith.constant 16 : index
    %152 = vector.load %arg10[%c0_78, %c16_79] : memref<8x32xf32, #tpu.memory_space<vmem>>, vector<8x8xf32>
    tpu.vector_store %arg10[%c0_78, %c16_79], %151 {strides = array<i32>} : memref<8x32xf32, #tpu.memory_space<vmem>>, vector<8x8xf32>,
    %153 = vector.extract_strided_slice %99 {offsets = [0, 24], sizes = [8, 8], strides = [1, 1]} : vector<8x32xf32> to vector<8x8xf32>
    %154 = vector.extract_strided_slice %104 {offsets = [0, 24], sizes = [16, 8], strides = [1, 1]} : vector<16x64xf32> to vector<16x8xf32>
    %155 = vector.extract_strided_slice %104 {offsets = [0, 56], sizes = [16, 8], strides = [1, 1]} : vector<16x64xf32> to vector<16x8xf32>
    %cst_80 = arith.constant dense<0.000000e+00> : vector<8x16xf32>
    %156 = tpu.matmul %153, %154, %cst_80 {dimension_numbers = #tpu.dot_dimension_numbers<[1], [1], [0], [0], [0, 0, 1, 0], [], []>} : vector<8x8xf32>, vector<16x8xf32>, vector<8x16xf32> -> vector<8x16xf32>
    %cst_81 = arith.constant dense<0xFF800000> : vector<8xf32>
    %157 = vector.multi_reduction <maximumf>, %156, %cst_81 [1] : vector<8x16xf32> to vector<8xf32>
    %158 = vector.shape_cast %157 : vector<8xf32> to vector<8x1xf32>
    %159 = vector.broadcast %158 : vector<8x1xf32> to vector<8x16xf32>
    %160 = arith.subf %156, %159 : vector<8x16xf32>
    %161 = math.exp %160 : vector<8x16xf32>
    %cst_82 = arith.constant dense<0.000000e+00> : vector<8xf32>
    %162 = vector.multi_reduction <add>, %161, %cst_82 [1] : vector<8x16xf32> to vector<8xf32>
    %163 = vector.shape_cast %162 : vector<8xf32> to vector<8x1xf32>
    %164 = tpu.reciprocal %163 : vector<8x1xf32> -> vector<8x1xf32>
    %cst_83 = arith.constant dense<0.000000e+00> : vector<8x8xf32>
    %165 = tpu.matmul %161, %155, %cst_83 {dimension_numbers = #tpu.dot_dimension_numbers<[1], [0], [0], [1], [0, 0, 1, 1], [], []>} : vector<8x16xf32>, vector<16x8xf32>, vector<8x8xf32> -> vector<8x8xf32>
    %166 = vector.broadcast %164 : vector<8x1xf32> to vector<8x8xf32>
    %167 = arith.mulf %165, %166 : vector<8x8xf32>
    %c0_84 = arith.constant 0 : index
    %c24_85 = arith.constant 24 : index
    %168 = vector.load %arg10[%c0_84, %c24_85] : memref<8x32xf32, #tpu.memory_space<vmem>>, vector<8x8xf32>
    tpu.vector_store %arg10[%c0_84, %c24_85], %167 {strides = array<i32>} : memref<8x32xf32, #tpu.memory_space<vmem>>, vector<8x8xf32>,
    %c0_86 = arith.constant 0 : index
    %c0_87 = arith.constant 0 : index
    %169 = vector.load %arg10[%c0_86, %c0_87] : memref<8x32xf32, #tpu.memory_space<vmem>>, vector<8x32xf32>
    %c0_88 = arith.constant 0 : index
    %c0_89 = arith.constant 0 : index
    %170 = vector.load %arg7[%c0_88, %c0_89] : memref<32x32xf32, #tpu.memory_space<vmem>>, vector<32x32xf32>
    %cst_90 = arith.constant dense<0.000000e+00> : vector<8x32xf32>
    %171 = tpu.matmul %169, %170, %cst_90 {dimension_numbers = #tpu.dot_dimension_numbers<[1], [0], [0], [1], [0, 0, 1, 1], [], []>} : vector<8x32xf32>, vector<32x32xf32>, vector<8x32xf32> -> vector<8x32xf32>
    %c0_91 = arith.constant 0 : index
    %c0_92 = arith.constant 0 : index
    %172 = vector.load %arg8[%c0_91, %c0_92] : memref<1x32xf32, #tpu.memory_space<vmem>>, vector<1x32xf32>
    %173 = vector.broadcast %172 : vector<1x32xf32> to vector<8x32xf32>
    %174 = arith.addf %171, %173 : vector<8x32xf32>
    %c1_93 = arith.constant 1 : index
    %c0_94 = arith.constant 0 : index
    %c0_95 = arith.constant 0 : index
    %175 = vector.load %arg9[%c1_93, %c0_94, %c0_95] : memref<2x8x32xf32, #tpu.memory_space<vmem>>, vector<1x8x32xf32>
    %176 = vector.shape_cast %175 : vector<1x8x32xf32> to vector<8x32xf32>
    %177 = vector.shape_cast %174 : vector<8x32xf32> to vector<1x8x32xf32>
    tpu.vector_store %arg9[%c1_93, %c0_94, %c0_95], %177 {strides = array<i32>} : memref<2x8x32xf32, #tpu.memory_space<vmem>>, vector<1x8x32xf32>,
    return
  }
  func.func @transform_0(%arg0: i32) -> (i32, i32, i32) {
    %c0_i32 = arith.constant 0 : i32
    %c0_i32_0 = arith.constant 0 : i32
    %c0_i32_1 = arith.constant 0 : i32
    return %arg0, %c0_i32, %c0_i32_0 : i32, i32, i32
  }
  func.func @transform_1(%arg0: i32) -> (i32, i32, i32) {
    %c0_i32 = arith.constant 0 : i32
    %c0_i32_0 = arith.constant 0 : i32
    %c0_i32_1 = arith.constant 0 : i32
    return %arg0, %c0_i32, %c0_i32_0 : i32, i32, i32
  }
  func.func @transform_2(%arg0: i32) -> (i32, i32) {
    %c0_i32 = arith.constant 0 : i32
    %c0_i32_0 = arith.constant 0 : i32
    %c0_i32_1 = arith.constant 0 : i32
    return %c0_i32, %c0_i32_0 : i32, i32
  }
  func.func @transform_3(%arg0: i32) -> (i32, i32) {
    %c0_i32 = arith.constant 0 : i32
    %c0_i32_0 = arith.constant 0 : i32
    %c0_i32_1 = arith.constant 0 : i32
    return %c0_i32, %c0_i32_0 : i32, i32
  }
  func.func @transform_4(%arg0: i32) -> (i32, i32) {
    %c0_i32 = arith.constant 0 : i32
    %c0_i32_0 = arith.constant 0 : i32
    %c0_i32_1 = arith.constant 0 : i32
    return %c0_i32, %c0_i32_0 : i32, i32
  }
  func.func @transform_5(%arg0: i32) -> (i32, i32) {
    %c0_i32 = arith.constant 0 : i32
    %c0_i32_0 = arith.constant 0 : i32
    %c0_i32_1 = arith.constant 0 : i32
    return %c0_i32, %c0_i32_0 : i32, i32
  }
  func.func @transform_6(%arg0: i32) -> (i32, i32) {
    %c0_i32 = arith.constant 0 : i32
    %c0_i32_0 = arith.constant 0 : i32
    %c0_i32_1 = arith.constant 0 : i32
    return %c0_i32, %c0_i32_0 : i32, i32
  }
  func.func @transform_7(%arg0: i32) -> (i32, i32) {
    %c0_i32 = arith.constant 0 : i32
    %c0_i32_0 = arith.constant 0 : i32
    %c0_i32_1 = arith.constant 0 : i32
    return %c0_i32, %c0_i32_0 : i32, i32
  }
  func.func @transform_8(%arg0: i32) -> (i32, i32, i32) {
    %c0_i32 = arith.constant 0 : i32
    %c0_i32_0 = arith.constant 0 : i32
    %c0_i32_1 = arith.constant 0 : i32
    return %arg0, %c0_i32, %c0_i32_0 : i32, i32, i32
  }
}

</mosaic_0001>

<bundles_post_ra>
// kernel: tpu_custom_call.1
= control target key start
LH: loop header
LB: loop body
LE: loop exit
PB: predicated region body
PF: predicated region fallthrough
CT: control target
= control target key end

     0   :  { %13 = vsyncpa [#allocation4], 0  ;;  %s3160_s0 = inlined_call_operand.hbm [shape: f32[2,8,32], index: 0, kind: input, shape index: {}]   ;;  %s3161_s1 = inlined_call_operand.hbm [shape: f32[2,16,48], index: 1, kind: input, shape index: {}]   ;;  %s3162_s2 = inlined_call_operand.hbm [shape: f32[32,32], index: 2, kind: input, shape index: {}]   ;;  %s3163_s3 = inlined_call_operand.vmem [shape: f32[1,32], index: 3, kind: input, shape index: {}]   ;;  %s3164_s4 = inlined_call_operand.hbm [shape: f32[48,64], index: 4, kind: input, shape index: {}]   ;;  %s3165_s5 = inlined_call_operand.vmem [shape: f32[1,64], index: 5, kind: input, shape index: {}]   ;;  %s3166_s6 = inlined_call_operand.hbm [shape: f32[32,32], index: 6, kind: input, shape index: {}]   ;;  %s3167_s7 = inlined_call_operand.vmem [shape: f32[1,32], index: 7, kind: input, shape index: {}]   ;;  %s3168_s8 = inlined_call_operand.hbm [shape: f32[2,8,32], index: 8, kind: output, shape index: {}]  }
   0x1   :  { %14 = vsyncpa [#allocation7], 0 }
   0x2   :  { %15 = vsyncpa [#allocation10], 0 }
   0x3   :  { %16 = vsyncpa [#allocation5], 0  ;;  %s2747_s27 = smov [#allocation6]   ;;  %s2748_s29 = smov [#allocation9]  }
   0x4   :  { %s34_s28 = sshll.u32 %s2747_s27, 4  ;;  %s60_s30 = sshll.u32 %s2748_s29, 4  ;;  %s35_s28 = int_to_ptr.vmem [resolvable:$true] %s34_s28  ;;  %s2812_s30 = int_to_ptr.vmem [resolvable:$true] %s60_s30 }
   0x5   :  { %s2607_s11 = scalar_lea.hbm %s3161_s1, 512 }
   0x6   :  { %p2608_p0 = scmp.ne.s32.totalorder %s3161_s1, %s2607_s11  ;;  %p2611_p1 = scmp.lt.u32.totalorder %s2607_s11, %s3161_s1 }
   0x8   :  { %p2613_p2 = pnand %p2611_p1, %p2608_p0 }
   0xa   :  { %2616 = shalt.err (!%p2613_p2)
}
   0xb   :  { %s2617_s16 = scalar_lea.vmem %s35_s28, 512  ;;  %p2622_p4 = scmp.lt.s32.totalorder %s35_s28, %s35_s28 }
   0xc   :  { %p2618_p3 = scmp.ne.s32.totalorder %s35_s28, %s2617_s16  ;;  %p2623_p5 = scmp.lt.s32.totalorder %s2617_s16, %s2617_s16 }
   0xe   :  { %p2624_p6 = por %p2623_p5, %p2622_p4 }
  0x10   :  { %p2625_p7 = pnand %p2624_p6, %p2618_p3 }
  0x12   :  { %2628 = shalt.err (!%p2625_p7)
}
  0x13   :  { %s2749_s17 = smov 128   ;;  %s2750_s18 = smov 8  }
  0x14   :  { %40 = dma.hbm_to_vmem [thread:$0]  %s3161_s1, 512, %s35_s28, [#allocation7], %s2749_s17, %s2749_s17, %s2750_s18  }
  0x15   :  { %s2629_s23 = scalar_lea.hbm %s3164_s4, 768 }
  0x16   :  { %p2630_p8 = scmp.ne.s32.totalorder %s3164_s4, %s2629_s23  ;;  %p2633_p9 = scmp.lt.u32.totalorder %s2629_s23, %s3164_s4 }
  0x18   :  { %p2635_p10 = pnand %p2633_p9, %p2630_p8 }
  0x1a   :  { %2638 = shalt.err (!%p2635_p10)
}
  0x1b   :  { %s2639_s29 = scalar_lea.vmem %s2812_s30, 768  ;;  %p2644_p12 = scmp.lt.s32.totalorder %s2812_s30, %s2812_s30 }
  0x1c   :  { %p2640_p11 = scmp.ne.s32.totalorder %s2812_s30, %s2639_s29  ;;  %p2645_p13 = scmp.lt.s32.totalorder %s2639_s29, %s2639_s29 }
  0x1e   :  { %p2646_p0 = por %p2645_p13, %p2644_p12 }
  0x20   :  { %p2647_p1 = pnand %p2646_p0, %p2640_p11 }
  0x22   :  { %2650 = shalt.err (!%p2647_p1)
}
  0x23   :  { %66 = dma.hbm_to_vmem [thread:$0]  %s3164_s4, 768, %s2812_s30, [#allocation10], %s2749_s17, %s2749_s17, %s2750_s18  }
  0x24   :  { %s2751_s9 = smov [#allocation3]   ;;  %s2752_s11 = smov [#allocation8]  }
  0x25   :  { %s22_s10 = sshll.u32 %s2751_s9, 4  ;;  %s46_s12 = sshll.u32 %s2752_s11, 4  ;;  %s23_s10 = int_to_ptr.vmem [resolvable:$true] %s22_s10  ;;  %s2849_s12 = int_to_ptr.vmem [resolvable:$true] %s46_s12 }
  0x26   :  { %s2651_s15 = scalar_lea.hbm %s3160_s0, 256 }
  0x27   :  { %p2652_p2 = scmp.ne.s32.totalorder %s3160_s0, %s2651_s15  ;;  %p2655_p3 = scmp.lt.u32.totalorder %s2651_s15, %s3160_s0 }
  0x29   :  { %p2657_p4 = pnand %p2655_p3, %p2652_p2 }
  0x2b   :  { %2660 = shalt.err (!%p2657_p4)
}
  0x2c   :  { %s2661_s4 = scalar_lea.vmem %s23_s10, 256  ;;  %p2666_p6 = scmp.lt.s32.totalorder %s23_s10, %s23_s10 }
  0x2d   :  { %p2662_p5 = scmp.ne.s32.totalorder %s23_s10, %s2661_s4  ;;  %p2667_p7 = scmp.lt.s32.totalorder %s2661_s4, %s2661_s4 }
  0x2f   :  { %p2668_p8 = por %p2667_p7, %p2666_p6 }
  0x31   :  { %p2669_p9 = pnand %p2668_p8, %p2662_p5 }
  0x33   :  { %2672 = shalt.err (!%p2669_p9)
}
  0x34   :  { %28 = dma.hbm_to_vmem [thread:$0]  %s3160_s0, 256, %s23_s10, [#allocation4], %s2749_s17, %s2749_s17, %s2750_s18  }
  0x35   :  { %s2673_s25 = scalar_lea.hbm %s3162_s2, 512 }
  0x36   :  { %p2674_p10 = scmp.ne.s32.totalorder %s3162_s2, %s2673_s25  ;;  %p2677_p11 = scmp.lt.u32.totalorder %s2673_s25, %s3162_s2 }
  0x38   :  { %p2679_p12 = pnand %p2677_p11, %p2674_p10 }
  0x3a   :  { %2682 = shalt.err (!%p2679_p12)
}
  0x3b   :  { %s2683_s28 = scalar_lea.vmem %s2849_s12, 512  ;;  %p2688_p0 = scmp.lt.s32.totalorder %s2849_s12, %s2849_s12 }
  0x3c   :  { %p2684_p13 = scmp.ne.s32.totalorder %s2849_s12, %s2683_s28  ;;  %p2689_p1 = scmp.lt.s32.totalorder %s2683_s28, %s2683_s28 }
  0x3e   :  { %p2690_p2 = por %p2689_p1, %p2688_p0 }
  0x40   :  { %p2691_p3 = pnand %p2690_p2, %p2684_p13 }
  0x42   :  { %2694 = shalt.err (!%p2691_p3)
}
  0x43   :  { %52 = dma.hbm_to_vmem [thread:$0]  %s3162_s2, 512, %s2849_s12, [#allocation7], %s2749_s17, %s2749_s17, %s2750_s18  }
  0x44   :  { %s2753_s10 = smov [#allocation11]   ;;  %s2695_s15 = scalar_lea.hbm %s3166_s6, 512 }
  0x45   :  { %s74_s11 = sshll.u32 %s2753_s10, 4  ;;  %p2696_p4 = scmp.ne.s32.totalorder %s3166_s6, %s2695_s15  ;;  %s75_s11 = int_to_ptr.vmem [resolvable:$true] %s74_s11 }
  0x46   :  { %p2699_p5 = scmp.lt.u32.totalorder %s2695_s15, %s3166_s6 }
  0x48   :  { %p2701_p6 = pnand %p2699_p5, %p2696_p4 }
  0x4a   :  { %2704 = shalt.err (!%p2701_p6)
}
  0x4b   :  { %s2705_s4 = scalar_lea.vmem %s75_s11, 512  ;;  %p2710_p8 = scmp.lt.s32.totalorder %s75_s11, %s75_s11 }
  0x4c   :  { %p2706_p7 = scmp.ne.s32.totalorder %s75_s11, %s2705_s4  ;;  %p2711_p9 = scmp.lt.s32.totalorder %s2705_s4, %s2705_s4 }
  0x4e   :  { %p2712_p10 = por %p2711_p9, %p2710_p8 }
  0x50   :  { %p2713_p11 = pnand %p2712_p10, %p2706_p7 }
  0x52   :  { %2716 = shalt.err (!%p2713_p11)
}
  0x53   :  { %80 = dma.hbm_to_vmem [thread:$0]  %s3166_s6, 512, %s75_s11, [#allocation10], %s2749_s17, %s2749_s17, %s2750_s18  }
  0x54   :  { %2739 = dma.done.wait [#allocation4], 256  }
  0x55   :  { %2740 = vsyncadd [#allocation4], 4294967040 }
  0x56   :  { %2741 = dma.done.wait [#allocation7], 1024  }
  0x57   :  { %2742 = vsyncadd [#allocation7], 4294966272 }
  0x58   :  { %2743 = dma.done.wait [#allocation10], 1280  }
  0x59   :  { %2744 = vsyncadd [#allocation10], 4294966016  ;;  %v2754_v0 = vmov 0.0|0.0   ;;  %vm2755_vm0 = vmmov 0   ;;  %v2756_v1 = vmov 0.0   ;;  %v187_v2 = vld [vmem:[#allocation9] sm:$0xff] }
  0x5a   :  { %2381 = vmatprep.subr.bf16.mxu0 %v2754_v0  ;;  %2203 = vmatprep.mubr.msk.f32.mxu0 %vm2755_vm0, %v2756_v1  ;;  %v188_v3 = vld [vmem:[#allocation9 + $0x8] sm:$0xff]  ;;  %v189_v4 = vld [vmem:[#allocation9 + $0x10] sm:$0xff]  ;;  %vm200_vm1 = vcmask 392192   ;;  %v190_v6 = vld [vmem:[#allocation9 + $0x18] sm:$0xff]  ;;  %vm112_vm2 = vcmask 261120   ;;  %vm282_vm3 = vcmask 64512  }
  0x5b   :  { %v2904_v5 = vpack.c.bf16 %v188_v3, %v187_v2  ;;  %v191_v7 = vld [vmem:[#allocation9 + $0x20] sm:$0xff]  ;;  %v192_v8 = vld [vmem:[#allocation9 + $0x28] sm:$0xff]  ;;  %v2906_v9 = vpack.c.bf16 %v190_v6, %v189_v4  ;;  %v103_v14 = vld [vmem:[#allocation8 + $0x10] sm:$0xff]  ;;  %s2759_s24 = smov 112   ;;  %s2760_s25 = smov 104   ;;  %vm362_vm5 = vcmask 130048  }
  0x5c   :  { %v101_v10 = vld [vmem:[#allocation8] sm:$0xff]  ;;  %v102_v11 = vld [vmem:[#allocation8 + $0x8] sm:$0xff]  ;;  %v104_v15 = vld [vmem:[#allocation8 + $0x18] sm:$0xff]  ;;  %v2914_v16 = vpack.c.bf16 %v192_v8, %v191_v7  ;;  %s2761_s26 = smov 88   ;;  %s2762_s27 = smov 80   ;;  %vm630_vm6 = vcmask 130112  }
  0x5d   :  { %v99_v12 = vld [vmem:[#allocation6] sm:$0xff]  ;;  %2388 = vmatprep.subr.bf16.mxu1 %v2904_v5  ;;  %v2909_v13 = vpack.c.bf16 %v102_v11, %v101_v10  ;;  %v2917_v17 = vpack.c.bf16 %v104_v15, %v103_v14  ;;  %v98_v18 = vld [vmem:[#allocation3] sm:$0xff]  ;;  %v100_v19 = vld [vmem:[#allocation6 + $0x8] sm:$0xff]  ;;  %s2763_s29 = smov 72   ;;  %s2764_s1 = smov 16   ;;  %vm808_vm7 = vcmask 195712  }
  0x5e   :  { %2218 = vmatprep.mubr.msk.f32.mxu1 %vm200_vm1, %v99_v12  ;;  %2390 = vmatpush3.bf16.msra.mxu1 %v2904_v5  ;;  %v2935_v21 = vld [vmem:[%s3165_s5] ss:$0 sm:$0xff]  ;;  %vm2947_vm4 = vmpackc.low %vm282_vm3, %vm282_vm3  ;;  %s2758_s5 = smov 96   ;;  %s2765_s28 = smov 24   ;;  %vm986_vm8 = vcmask 261312  }
  0x5f   :  { %2392 = vmatprep.subr.bf16.mxu1 %v2906_v9  ;;  %2383 = vmatpush3.bf16.msra.mxu0 %v2909_v13  ;;  %v2940_v23 = vld [vmem:[%s3163_s3] ss:$0 sm:$0xff]  ;;  %s2757_s3 = smov 120  }
  0x60   :  { %2384 = vmatprep.subr.bf16.mxu0 %v2754_v0 }
  0x62   :  { %2394 = vmatpush3.bf16.msra.mxu1 %v2906_v9 }
  0x63   :  { %2396 = vmatprep.subr.bf16.mxu1 %v2914_v16  ;;  %2386 = vmatpush3.bf16.msra.mxu0 %v2917_v17 }
  0x64   :  { %2399 = vmatprep.subr.bf16.mxu0 %v2754_v0 }
  0x66   :  { %2398 = vmatpush3.bf16.msra.mxu1 %v2914_v16  ;;  %2204 = vmatmul.mubr.msk.f32.vlgmr.msra.gmra.mrb[0].mxu0 %vm112_vm2, %v98_v18 }
  0x67   :  { %2225 = vmatprep.mubr.msk.f32.mxu0 %vm2755_vm0, %v2756_v1  ;;  %2403 = vmatprep.subr.bf16.mxu1 %v2754_v0 }
  0x69   :  { %2219 = vmatmul.mubr.msk.f32.vlgmr.msra.gmra.mrb[0].mxu1 %vm200_vm1, %v100_v19 }
  0x6a   :  { %2232 = vmatprep.mubr.msk.f32.mxu1 %vm2755_vm0, %v2756_v1 }
 0x139   :  { %v182_v20 = vpop.f32.mrb[0].mxu0 }
 0x13a   :  { %v2205_v22 = vpop.f32.mrb[1].mxu0  ;;  %v183_v28 = vadd.f32 %v2940_v23, %v182_v20 }
 0x13c   :  { %v2220_v24 = vpop.f32.mrb[0].mxu1  ;;  %v186_v32 = vmul.f32 0.35355338, %v183_v28 }
 0x13d   :  { %v279_v25 = vadd.f32 %v2220_v24, %v2935_v21  ;;  %v273_v26 = vpop.f32.mrb[1].mxu1 }
 0x13e   :  { %v274_v27 = vadd.f32 %v2935_v21, %v273_v26 }
 0x140   :  { %v2951_v30 = vpack.i.bf16 %v279_v25, %v274_v27  ;;  %v2400_v31 = vpack.c.bf16 %v279_v25, %v274_v27 }
 0x142   :  { %2506 = vrot.lane.b32.xlu0 %v2951_v30, %s2757_s3  ;;  %2402 = vmatpush3.bf16.xpose.msk.msra.mxu0 %vm2947_vm4, %v2400_v31 }
 0x143   :  { %2406 = vmatprep.subr.bf16.mxu0 %v2754_v0 }
 0x146   :  { %454 = vrot.lane.b32.xlu0 %v186_v32, %s2757_s3 }
 0x149   :  { %2226 = vmatmul.mubr.msk.f32.vlgmr.msra.gmra.mrb[2].mxu0 %vm282_vm3, %v186_v32 }
 0x14a   :  { %2511 = vrot.lane.b32.xlu0 %v2951_v30, %s2758_s5  ;;  %2239 = vmatprep.mubr.msk.f32.mxu0 %vm2755_vm0, %v2756_v1 }
 0x14e   :  { %2521 = vrot.lane.b32.xlu0 %v2951_v30, %s2759_s24 }
 0x152   :  { %2526 = vrot.lane.b32.xlu0 %v2951_v30, %s2760_s25 }
 0x156   :  { %632 = vrot.lane.b32.xlu0 %v186_v32, %s2759_s24 }
 0x15a   :  { %810 = vrot.lane.b32.xlu0 %v186_v32, %s2760_s25 }
 0x1b4   :  { %v2507_v33 = vpop.permute.xlu0 %2506 }
 0x1b5   :  { %v2509_v34 = vunpack.i.h.bf16 %v2507_v33  ;;  %v2508_v35 = vunpack.i.l.bf16 %v2507_v33 }
 0x1b7   :  { %v2407_v36 = vpack.c.bf16 %v2509_v34, %v2508_v35 }
 0x1b8   :  { %v455_v37 = vpop.permute.xlu0 %454 }
 0x1b9   :  { %2409 = vmatpush3.bf16.xpose.msk.msra.mxu0 %vm2947_vm4, %v2407_v36 }
 0x1ba   :  { %2420 = vmatprep.subr.bf16.mxu0 %v2754_v0 }
 0x1bc   :  { %v2512_v38 = vpop.permute.xlu0 %2511 }
 0x1bd   :  { %v2514_v39 = vunpack.i.h.bf16 %v2512_v38  ;;  %v2513_v40 = vunpack.i.l.bf16 %v2512_v38 }
 0x1bf   :  { %v2404_v41 = vpack.c.bf16 %v2514_v39, %v2513_v40 }
 0x1c0   :  { %v2522_v42 = vpop.permute.xlu0 %2521  ;;  %2240 = vmatmul.mubr.msk.f32.vlgmr.msra.gmra.mrb[4].mxu0 %vm282_vm3, %v455_v37 }
 0x1c1   :  { %2405 = vmatpush3.bf16.msra.mxu1 %v2404_v41  ;;  %2267 = vmatprep.mubr.msk.f32.mxu0 %vm2755_vm0, %v2756_v1  ;;  %v2524_v8 = vunpack.i.h.bf16 %v2522_v42  ;;  %v2523_v10 = vunpack.i.l.bf16 %v2522_v42 }
 0x1c2   :  { %2410 = vmatprep.subr.bf16.mxu1 %v2754_v0 }
 0x1c3   :  { %v2414_v12 = vpack.c.bf16 %v2524_v8, %v2523_v10  ;;  %v1077_v10 = vld [vmem:[#allocation6 + $0x10] sm:$0xff] }
 0x1c4   :  { %v2527_v43 = vpop.permute.xlu0 %2526 }
 0x1c5   :  { %v2529_v44 = vunpack.i.h.bf16 %v2527_v43  ;;  %v2528_v45 = vunpack.i.l.bf16 %v2527_v43 }
 0x1c7   :  { %v2421_v46 = vpack.c.bf16 %v2529_v44, %v2528_v45 }
 0x1c8   :  { %v633_v47 = vpop.permute.xlu0 %632 }
 0x1c9   :  { %2423 = vmatpush3.bf16.xpose.msk.msra.mxu0 %vm2947_vm4, %v2421_v46 }
 0x1ca   :  { %2433 = vmatprep.subr.bf16.mxu0 %v2754_v0 }
 0x1cc   :  { %v811_v48 = vpop.permute.xlu0 %810 }
 0x1d0   :  { %2268 = vmatmul.mubr.msk.f32.vlgmr.msra.gmra.mrb[6].mxu0 %vm282_vm3, %v811_v48 }
 0x1d1   :  { %2435 = vmatpush3.bf16.msra.mxu0 %v2909_v13  ;;  %2296 = vmatprep.mubr.msk.f32.mxu0 %vm2755_vm0, %v2756_v1 }
 0x1d2   :  { %2436 = vmatprep.subr.bf16.mxu0 %v2754_v0 }
 0x1d5   :  { %2438 = vmatpush3.bf16.msra.mxu0 %v2917_v17 }
 0x1d6   :  { %2451 = vmatprep.subr.bf16.mxu0 %v2754_v0 }
 0x21c   :  { %v358_v49 = vpop.f32.mrb[2].mxu0 }
 0x21d   :  { %v363_v50 = vsel %vm362_vm5, %v358_v49, -inf  ;;  %v2227_v51 = vpop.f32.mrb[3].mxu0 }
 0x21e   :  { %364 = vmax.xlane.f32.xlu1 %v363_v50 }
 0x293   :  { %v532_v52 = vpop.f32.mrb[4].mxu0 }
 0x294   :  { %v2241_v53 = vpop.f32.mrb[5].mxu0  ;;  %v536_v54 = vsel %vm362_vm5, %v532_v52, -inf }
 0x295   :  { %537 = vmax.xlane.f32.xlu1 %v536_v54  ;;  %v989_v53 = vld [vmem:[#allocation11] sm:$0xff]  ;;  %v990_v54 = vld [vmem:[#allocation11 + $0x8] sm:$0xff] }
 0x2a3   :  { %v888_v55 = vpop.f32.mrb[6].mxu0 }
 0x2a4   :  { %v2269_v56 = vpop.f32.mrb[7].mxu0  ;;  %v892_v57 = vsel %vm362_vm5, %v888_v55, -inf }
 0x2a5   :  { %893 = vmax.xlane.f32.xlu0 %v892_v57  ;;  %v991_v56 = vld [vmem:[#allocation11 + $0x10] sm:$0xff]  ;;  %v992_v57 = vld [vmem:[#allocation11 + $0x18] sm:$0xff] }
 0x2a6   :  { %2516 = vrot.lane.b32.xlu1 %v2951_v30, %s2761_s26 }
 0x2ab   :  { %v365_v58 = vpop.xlane.xlu1 %364 }
 0x2ac   :  { %v366_v59 = vsub.f32 %v358_v49, %v365_v58  ;;  %v3028_v58 = vpack.c.bf16 %v992_v57, %v991_v56 }
 0x2ae   :  { %v367_v60 = vmul.f32 1.442695, %v366_v59 }
 0x2b0   :  { %2575 = vpow2.f32 %v367_v60 }
 0x2ba   :  { %v2576_v61 = vpop.eup %2575 }
 0x2bb   :  { %2233 = vmatmul.mubr.msk.f32.vlgmr.msra.gmra.mrb[2].mxu1 %vm362_vm5, %v2576_v61  ;;  %2531 = vrot.lane.b32.xlu0 %v2951_v30, %s2762_s27  ;;  %v369_v32 = vsel %vm362_vm5, %v2576_v61, 0.0 }
 0x2bc   :  { %2246 = vmatprep.mubr.msk.f32.mxu1 %vm2755_vm0, %v2756_v1 }
 0x322   :  { %v538_v62 = vpop.xlane.xlu1 %537 }
 0x323   :  { %v539_v63 = vsub.f32 %v532_v52, %v538_v62 }
 0x325   :  { %v540_v2 = vmul.f32 1.442695, %v539_v63 }
 0x326   :  { %v2517_v3 = vpop.permute.xlu1 %2516 }
 0x327   :  { %2577 = vpow2.f32 %v540_v2  ;;  %v2519_v4 = vunpack.i.h.bf16 %v2517_v3  ;;  %v2518_v6 = vunpack.i.l.bf16 %v2517_v3 }
 0x329   :  { %v2411_v7 = vpack.c.bf16 %v2519_v4, %v2518_v6  ;;  %v1075_v6 = vld [vmem:[#allocation3 + $0x8] sm:$0xff] }
 0x32a   :  { %2297 = vmatmul.mubr.msk.f32.vlgmr.msra.gmra.mrb[8].mxu0 %vm112_vm2, %v1075_v6 }
 0x32b   :  { %2412 = vmatpush3.bf16.msra.mxu1 %v2411_v7  ;;  %2318 = vmatprep.mubr.msk.f32.mxu0 %vm2755_vm0, %v2756_v1 }
 0x32c   :  { %2413 = vmatprep.subr.bf16.mxu1 %v2754_v0 }
 0x331   :  { %v2578_v11 = vpop.eup %2577 }
 0x332   :  { %2247 = vmatmul.mubr.msk.f32.vlgmr.msra.gmra.mrb[4].mxu1 %vm362_vm5, %v2578_v11  ;;  %v894_v13 = vpop.xlane.xlu0 %893  ;;  %v542_v31 = vsel %vm362_vm5, %v2578_v11, 0.0 }
 0x333   :  { %v895_v14 = vsub.f32 %v888_v55, %v894_v13  ;;  %2253 = vmatprep.mubr.msk.f32.mxu1 %vm2755_vm0, %v2756_v1  ;;  %v3025_v55 = vpack.c.bf16 %v990_v54, %v989_v53 }
 0x334   :  { %2416 = vmatpush3.bf16.xpose.msk.msra.mxu1 %vm2947_vm4, %v2414_v12  ;;  %v1078_v12 = vld [vmem:[#allocation6 + $0x18] sm:$0xff] }
 0x335   :  { %2417 = vmatprep.subr.bf16.mxu1 %v2754_v0  ;;  %v896_v35 = vmul.f32 1.442695, %v895_v14 }
 0x336   :  { %v2532_v15 = vpop.permute.xlu0 %2531 }
 0x337   :  { %v2534_v17 = vunpack.i.h.bf16 %v2532_v15  ;;  %v2533_v18 = vunpack.i.l.bf16 %v2532_v15 }
 0x339   :  { %v2418_v19 = vpack.c.bf16 %v2534_v17, %v2533_v18 }
 0x33b   :  { %2254 = vmatmul.mubr.msk.f32.vlgmr.msra.gmra.mrb[6].mxu1 %vm282_vm3, %v633_v47 }
 0x33c   :  { %2419 = vmatpush3.bf16.msra.mxu1 %v2418_v19  ;;  %2260 = vmatprep.mubr.msk.f32.mxu1 %vm2755_vm0, %v2756_v1 }
 0x33d   :  { %2424 = vmatprep.subr.bf16.mxu1 %v2754_v0 }
 0x38e   :  { %v448_v20 = vpop.f32.mrb[2].mxu1 }
 0x38f   :  { %v2234_v22 = vpop.f32.mrb[3].mxu1 }
 0x3fd   :  { %v1159_v13 = vpop.f32.mrb[8].mxu0 }
 0x3fe   :  { %v2298_v14 = vpop.f32.mrb[9].mxu0 }
 0x405   :  { %v621_v24 = vpop.f32.mrb[4].mxu1 }
 0x406   :  { %v2248_v25 = vpop.f32.mrb[5].mxu1 }
 0x40e   :  { %v710_v26 = vpop.f32.mrb[6].mxu1 }
 0x40f   :  { %v2255_v27 = vpop.f32.mrb[7].mxu1  ;;  %v714_v28 = vsel %vm362_vm5, %v710_v26, -inf }
 0x410   :  { %715 = vmax.xlane.f32.xlu1 %v714_v28 }
 0x421   :  { %2536 = vrot.lane.b32.xlu1 %v2951_v30, %s2763_s29 }
 0x445   :  { %543 = vadd.xlane.f32.xlu1 %v542_v31 }
 0x449   :  { %370 = vadd.xlane.f32.xlu1 %v369_v32 }
 0x49d   :  { %v716_v33 = vpop.xlane.xlu1 %715 }
 0x49e   :  { %v717_v34 = vsub.f32 %v710_v26, %v716_v33 }
 0x4a0   :  { %v718_v36 = vmul.f32 1.442695, %v717_v34 }
 0x4a1   :  { %v2537_v37 = vpop.permute.xlu1 %2536 }
 0x4a2   :  { %2579 = vpow2.f32 %v718_v36  ;;  %v2539_v38 = vunpack.i.h.bf16 %v2537_v37  ;;  %v2538_v39 = vunpack.i.l.bf16 %v2537_v37 }
 0x4a3   :  { %2581 = vpow2.f32 %v896_v35 }
 0x4a4   :  { %v2425_v41 = vpack.c.bf16 %v2539_v38, %v2538_v39 }
 0x4ac   :  { %v2580_v40 = vpop.eup %2579 }
 0x4ad   :  { %2261 = vmatmul.mubr.msk.f32.vlgmr.msra.gmra.mrb[8].mxu1 %vm362_vm5, %v2580_v40  ;;  %v720_v30 = vsel %vm362_vm5, %v2580_v40, 0.0  ;;  %v2582_v42 = vpop.eup %2581 }
 0x4ae   :  { %2426 = vmatpush3.bf16.msra.mxu1 %v2425_v41  ;;  %721 = vadd.xlane.f32.xlu0 %v720_v30  ;;  %v898_v43 = vsel %vm362_vm5, %v2582_v42, 0.0 }
 0x4af   :  { %2274 = vmatprep.mubr.msk.f32.mxu1 %vm2755_vm0, %v2756_v1  ;;  %2427 = vmatprep.subr.bf16.mxu1 %v2754_v0 }
 0x4b1   :  { %2275 = vmatmul.mubr.msk.f32.vlgmr.msra.gmra.mrb[10].mxu1 %vm362_vm5, %v2582_v42 }
 0x4b2   :  { %899 = vadd.xlane.f32.xlu0 %v898_v43  ;;  %2285 = vmatprep.mubr.msk.f32.mxu1 %vm2755_vm0, %v2756_v1 }
 0x4b3   :  { %2429 = vmatpush3.bf16.msra.mxu1 %v3025_v55 }
 0x4b4   :  { %2430 = vmatprep.subr.bf16.mxu1 %v2754_v0 }
 0x4b7   :  { %2432 = vmatpush3.bf16.msra.mxu1 %v3028_v58 }
 0x4b8   :  { %2440 = vmatprep.subr.bf16.mxu1 %v2904_v5 }
 0x4d2   :  { %v544_v44 = vpop.xlane.xlu1 %543 }
 0x4d3   :  { %2583 = vrcp.f32 %v544_v44 }
 0x4d6   :  { %v371_v45 = vpop.xlane.xlu1 %370 }
 0x4d7   :  { %2585 = vrcp.f32 %v371_v45 }
 0x4dd   :  { %v2584_v46 = vpop.eup %2583 }
 0x4de   :  { %v625_v47 = vmul.f32 %v2584_v46, %v621_v24 }
 0x4e0   :  { %627 = vrot.lane.b32.xlu0 %v625_v47, %s2750_s18 }
 0x4e1   :  { %v2586_v48 = vpop.eup %2585 }
 0x4e2   :  { %v452_v49 = vmul.f32 %v2586_v48, %v448_v20 }
 0x4e4   :  { %453 = vst.msk [vmem:[#allocation2] sm:$0xff] %vm282_vm3, %v452_v49 }
 0x53b   :  { %v722_v50 = vpop.xlane.xlu0 %721 }
 0x53c   :  { %2587 = vrcp.f32 %v722_v50 }
 0x53f   :  { %v900_v51 = vpop.xlane.xlu0 %899 }
 0x540   :  { %2589 = vrcp.f32 %v900_v51 }
 0x546   :  { %v2588_v59 = vpop.eup %2587 }
 0x54a   :  { %v2590_v63 = vpop.eup %2589 }
 0x552   :  { %v628_v52 = vpop.permute.xlu0 %627 }
 0x553   :  { %631 = vst.msk [vmem:[#allocation2] sm:$0xff] %vm630_vm6, %v628_v52 }
 0x580   :  { %v799_v60 = vpop.f32.mrb[8].mxu1 }
 0x581   :  { %v803_v61 = vmul.f32 %v2588_v59, %v799_v60  ;;  %v2262_v62 = vpop.f32.mrb[9].mxu1 }
 0x583   :  { %805 = vrot.lane.b32.xlu1 %v803_v61, %s2764_s1 }
 0x584   :  { %v977_v2 = vpop.f32.mrb[10].mxu1 }
 0x585   :  { %v981_v3 = vmul.f32 %v2590_v63, %v977_v2  ;;  %v2276_v4 = vpop.f32.mrb[11].mxu1 }
 0x587   :  { %983 = vrot.lane.b32.xlu1 %v981_v3, %s2765_s28 }
 0x5f5   :  { %v806_v7 = vpop.permute.xlu1 %805 }
 0x5f6   :  { %809 = vst.msk [vmem:[#allocation2] sm:$0xff] %vm808_vm7, %v806_v7 }
 0x5f9   :  { %v984_v8 = vpop.permute.xlu1 %983 }
 0x5fa   :  { %987 = vst.msk [vmem:[#allocation2] sm:$0xff] %vm986_vm8, %v984_v8 }
 0x601   :  { %v988_v11 = vld [vmem:[#allocation2] sm:$0xff] }
 0x602   :  { %2286 = vmatmul.mubr.msk.f32.vlgmr.msra.gmra.mrb[12].mxu1 %vm112_vm2, %v988_v11 }
 0x603   :  { %2442 = vmatpush3.bf16.msra.mxu1 %v2904_v5  ;;  %2311 = vmatprep.mubr.msk.f32.mxu1 %vm200_vm1, %v1077_v10  ;;  %v1160_v5 = vadd.f32 %v2940_v23, %v1159_v13 }
 0x604   :  { %2444 = vmatprep.subr.bf16.mxu1 %v2906_v9 }
 0x605   :  { %v1163_v15 = vmul.f32 0.35355338, %v1160_v5 }
 0x607   :  { %2446 = vmatpush3.bf16.msra.mxu1 %v2906_v9  ;;  %1428 = vrot.lane.b32.xlu1 %v1163_v15, %s2757_s3  ;;  %v3056_v9 = vld [vmem:[%s3167_s7] ss:$0 sm:$0xff]  ;;  %s2766_s7 = smov [#allocation12]  }
 0x608   :  { %2448 = vmatprep.subr.bf16.mxu1 %v2914_v16  ;;  %s2051_s10 = sshll.u32 %s2766_s7, 4  ;;  %s2052_s10 = int_to_ptr.vmem [resolvable:$true] %s2051_s10 }
 0x609   :  { %s2717_s11 = scalar_lea.vmem %s2052_s10, 256  ;;  %p2722_p13 = scmp.lt.s32.totalorder %s2052_s10, %s2052_s10 }
 0x60a   :  { %p2718_p12 = scmp.ne.s32.totalorder %s2052_s10, %s2717_s11  ;;  %p2723_p0 = scmp.lt.s32.totalorder %s2717_s11, %s2717_s11 }
 0x60b   :  { %2450 = vmatpush3.bf16.msra.mxu1 %v2914_v16 }
 0x60c   :  { %2458 = vmatprep.subr.bf16.mxu1 %v2754_v0  ;;  %p2724_p1 = por %p2723_p0, %p2722_p13 }
 0x60e   :  { %2312 = vmatmul.mubr.msk.f32.vlgmr.msra.gmra.mrb[14].mxu1 %vm200_vm1, %v1078_v12  ;;  %p2725_p2 = pnand %p2724_p1, %p2718_p12 }
 0x60f   :  { %2332 = vmatprep.mubr.msk.f32.mxu1 %vm2755_vm0, %v2756_v1 }
 0x679   :  { %v1429_v31 = vpop.permute.xlu1 %1428 }
 0x6d5   :  { %v1069_v16 = vpop.f32.mrb[12].mxu1 }
 0x6d6   :  { %v1070_v17 = vadd.f32 %v3056_v9, %v1069_v16  ;;  %v2287_v18 = vpop.f32.mrb[13].mxu1 }
 0x6d8   :  { %1073 = vst.msk [vmem:[#allocation12] sm:$0xff] %vm112_vm2, %v1070_v17 }
 0x6e1   :  { %v2313_v19 = vpop.f32.mrb[14].mxu1 }
 0x6e2   :  { %v1255_v20 = vadd.f32 %v2313_v19, %v2935_v21  ;;  %v1249_v22 = vpop.f32.mrb[15].mxu1 }
 0x6e3   :  { %v1250_v23 = vadd.f32 %v2935_v21, %v1249_v22 }
 0x6e5   :  { %v3062_v24 = vpack.i.bf16 %v1255_v20, %v1250_v23  ;;  %v2452_v25 = vpack.c.bf16 %v1255_v20, %v1250_v23 }
 0x6e7   :  { %2541 = vrot.lane.b32.xlu0 %v3062_v24, %s2757_s3  ;;  %2454 = vmatpush3.bf16.xpose.msk.msra.mxu0 %vm2947_vm4, %v2452_v25 }
 0x6e8   :  { %2551 = vrot.lane.b32.xlu1 %v3062_v24, %s2761_s26  ;;  %2455 = vmatprep.subr.bf16.mxu0 %v2754_v0 }
 0x6ee   :  { %2319 = vmatmul.mubr.msk.f32.vlgmr.msra.gmra.mrb[10].mxu0 %vm282_vm3, %v1163_v15 }
 0x6ef   :  { %2325 = vmatprep.mubr.msk.f32.mxu0 %vm2755_vm0, %v2756_v1 }
 0x759   :  { %v2542_v21 = vpop.permute.xlu0 %2541 }
 0x75a   :  { %v2544_v26 = vunpack.i.h.bf16 %v2542_v21  ;;  %v2543_v27 = vunpack.i.l.bf16 %v2542_v21  ;;  %v2552_v44 = vpop.permute.xlu1 %2551 }
 0x75b   :  { %v2554_v45 = vunpack.i.h.bf16 %v2552_v44  ;;  %v2553_v46 = vunpack.i.l.bf16 %v2552_v44 }
 0x75c   :  { %v2459_v28 = vpack.c.bf16 %v2544_v26, %v2543_v27 }
 0x75d   :  { %v2463_v48 = vpack.c.bf16 %v2554_v45, %v2553_v46 }
 0x75e   :  { %2461 = vmatpush3.bf16.xpose.msk.msra.mxu1 %vm2947_vm4, %v2459_v28 }
 0x75f   :  { %2469 = vmatprep.subr.bf16.mxu1 %v2754_v0 }
 0x765   :  { %2333 = vmatmul.mubr.msk.f32.vlgmr.msra.gmra.mrb[16].mxu1 %vm282_vm3, %v1429_v31 }
 0x766   :  { %2353 = vmatprep.mubr.msk.f32.mxu1 %vm2755_vm0, %v2756_v1 }
 0x7c1   :  { %v1333_v32 = vpop.f32.mrb[10].mxu0 }
 0x7c2   :  { %v1337_v33 = vsel %vm362_vm5, %v1333_v32, -inf  ;;  %v2320_v34 = vpop.f32.mrb[11].mxu0 }
 0x7c3   :  { %1338 = vmax.xlane.f32.xlu0 %v1337_v33 }
 0x7d9   :  { %2546 = vrot.lane.b32.xlu0 %v3062_v24, %s2758_s5 }
 0x7dd   :  { %2556 = vrot.lane.b32.xlu0 %v3062_v24, %s2759_s24 }
 0x838   :  { %v1506_v35 = vpop.f32.mrb[16].mxu1 }
 0x839   :  { %v2334_v36 = vpop.f32.mrb[17].mxu1  ;;  %v1510_v37 = vsel %vm362_vm5, %v1506_v35, -inf }
 0x83a   :  { %1511 = vmax.xlane.f32.xlu1 %v1510_v37 }
 0x84b   :  { %1605 = vrot.lane.b32.xlu1 %v1163_v15, %s2759_s24 }
 0x84f   :  { %2561 = vrot.lane.b32.xlu1 %v3062_v24, %s2762_s27 }
 0x850   :  { %v1339_v38 = vpop.xlane.xlu0 %1338 }
 0x851   :  { %v1340_v39 = vsub.f32 %v1333_v32, %v1339_v38 }
 0x853   :  { %v1341_v40 = vmul.f32 1.442695, %v1340_v39  ;;  %2566 = vrot.lane.b32.xlu1 %v3062_v24, %s2760_s25 }
 0x854   :  { %v2547_v41 = vpop.permute.xlu0 %2546 }
 0x855   :  { %2591 = vpow2.f32 %v1341_v40  ;;  %v2549_v30 = vunpack.i.h.bf16 %v2547_v41  ;;  %v2548_v42 = vunpack.i.l.bf16 %v2547_v41 }
 0x857   :  { %v2456_v43 = vpack.c.bf16 %v2549_v30, %v2548_v42  ;;  %1782 = vrot.lane.b32.xlu1 %v1163_v15, %s2760_s25 }
 0x858   :  { %v2557_v53 = vpop.permute.xlu0 %2556 }
 0x859   :  { %2457 = vmatpush3.bf16.msra.mxu0 %v2456_v43  ;;  %v2559_v59 = vunpack.i.h.bf16 %v2557_v53  ;;  %v2558_v60 = vunpack.i.l.bf16 %v2557_v53 }
 0x85a   :  { %2462 = vmatprep.subr.bf16.mxu0 %v2754_v0 }
 0x85b   :  { %v2466_v63 = vpack.c.bf16 %v2559_v59, %v2558_v60 }
 0x85f   :  { %v3093_v47 = vpop.eup %2591 }
 0x860   :  { %2326 = vmatmul.mubr.msk.f32.vlgmr.msra.gmra.mrb[12].mxu0 %vm362_vm5, %v3093_v47  ;;  %v1343_v37 = vsel %vm362_vm5, %v3093_v47, 0.0 }
 0x861   :  { %2464 = vmatpush3.bf16.msra.mxu0 %v2463_v48  ;;  %2339 = vmatprep.mubr.msk.f32.mxu0 %vm2755_vm0, %v2756_v1 }
 0x862   :  { %2465 = vmatprep.subr.bf16.mxu0 %v2754_v0 }
 0x8c7   :  { %v1512_v49 = vpop.xlane.xlu1 %1511 }
 0x8c8   :  { %v1513_v50 = vsub.f32 %v1506_v35, %v1512_v49 }
 0x8ca   :  { %v1514_v51 = vmul.f32 1.442695, %v1513_v50 }
 0x8cb   :  { %v1606_v52 = vpop.permute.xlu1 %1605 }
 0x8cc   :  { %2593 = vpow2.f32 %v1514_v51 }
 0x8cf   :  { %v2562_v54 = vpop.permute.xlu1 %2561 }
 0x8d0   :  { %v2564_v56 = vunpack.i.h.bf16 %v2562_v54  ;;  %v2563_v57 = vunpack.i.l.bf16 %v2562_v54 }
 0x8d2   :  { %v2470_v61 = vpack.c.bf16 %v2564_v56, %v2563_v57 }
 0x8d3   :  { %v2567_v17 = vpop.permute.xlu1 %2566 }
 0x8d4   :  { %2471 = vmatpush3.bf16.msra.mxu1 %v2470_v61  ;;  %v2569_v18 = vunpack.i.h.bf16 %v2567_v17  ;;  %v2568_v19 = vunpack.i.l.bf16 %v2567_v17 }
 0x8d5   :  { %2472 = vmatprep.subr.bf16.mxu1 %v2754_v0 }
 0x8d6   :  { %v2594_v62 = vpop.eup %2593  ;;  %v2473_v22 = vpack.c.bf16 %v2569_v18, %v2568_v19 }
 0x8d7   :  { %2340 = vmatmul.mubr.msk.f32.vlgmr.msra.gmra.mrb[14].mxu0 %vm362_vm5, %v2594_v62  ;;  %v1516_v31 = vsel %vm362_vm5, %v2594_v62, 0.0 }
 0x8d8   :  { %2468 = vmatpush3.bf16.xpose.msk.msra.mxu0 %vm2947_vm4, %v2466_v63  ;;  %2346 = vmatprep.mubr.msk.f32.mxu0 %vm2755_vm0, %v2756_v1 }
 0x8d9   :  { %2476 = vmatprep.subr.bf16.mxu0 %v2754_v0 }
 0x8df   :  { %2347 = vmatmul.mubr.msk.f32.vlgmr.msra.gmra.mrb[16].mxu0 %vm282_vm3, %v1606_v52 }
 0x8e0   :  { %2367 = vmatprep.mubr.msk.f32.mxu0 %vm2755_vm0, %v2756_v1 }
 0x933   :  { %v3110_v2 = vpop.f32.mrb[12].mxu0 }
 0x934   :  { %v2327_v3 = vpop.f32.mrb[13].mxu0 }
 0x9aa   :  { %v1595_v4 = vpop.f32.mrb[14].mxu0 }
 0x9ab   :  { %v2341_v6 = vpop.f32.mrb[15].mxu0 }
 0x9b2   :  { %v1683_v7 = vpop.f32.mrb[16].mxu0 }
 0x9b3   :  { %v2348_v8 = vpop.f32.mrb[17].mxu0  ;;  %v1687_v10 = vsel %vm362_vm5, %v1683_v7, -inf }
 0x9b4   :  { %1688 = vmax.xlane.f32.xlu0 %v1687_v10 }
 0x9ca   :  { %2571 = vrot.lane.b32.xlu0 %v3062_v24, %s2763_s29  ;;  %v1783_v24 = vpop.permute.xlu1 %1782 }
 0xa41   :  { %v1689_v11 = vpop.xlane.xlu0 %1688 }
 0xa42   :  { %v1690_v12 = vsub.f32 %v1683_v7, %v1689_v11 }
 0xa44   :  { %v1691_v13 = vmul.f32 1.442695, %v1690_v12 }
 0xa45   :  { %v2572_v5 = vpop.permute.xlu0 %2571 }
 0xa46   :  { %2595 = vpow2.f32 %v1691_v13  ;;  %v2574_v14 = vunpack.i.h.bf16 %v2572_v5  ;;  %v2573_v15 = vunpack.i.l.bf16 %v2572_v5 }
 0xa48   :  { %v2477_v16 = vpack.c.bf16 %v2574_v14, %v2573_v15 }
 0xa4a   :  { %2478 = vmatpush3.bf16.msra.mxu0 %v2477_v16 }
 0xa4b   :  { %2479 = vmatprep.subr.bf16.mxu0 %v2754_v0 }
 0xa50   :  { %v2596_v20 = vpop.eup %2595 }
 0xa51   :  { %2354 = vmatmul.mubr.msk.f32.vlgmr.msra.gmra.mrb[18].mxu1 %vm362_vm5, %v2596_v20  ;;  %v1693_v23 = vsel %vm362_vm5, %v2596_v20, 0.0 }
 0xa52   :  { %2475 = vmatpush3.bf16.xpose.msk.msra.mxu1 %vm2947_vm4, %v2473_v22  ;;  %1694 = vadd.xlane.f32.xlu0 %v1693_v23 }
 0xa53   :  { %2360 = vmatprep.mubr.msk.f32.mxu1 %vm2755_vm0, %v2756_v1 }
 0xa59   :  { %2361 = vmatmul.mubr.msk.f32.vlgmr.msra.gmra.mrb[20].mxu1 %vm282_vm3, %v1783_v24 }
 0xadf   :  { %v1695_v38 = vpop.xlane.xlu0 %1694 }
 0xb24   :  { %v1772_v25 = vpop.f32.mrb[18].mxu1 }
 0xb25   :  { %v2355_v21 = vpop.f32.mrb[19].mxu1 }
 0xb2c   :  { %v1860_v26 = vpop.f32.mrb[20].mxu1 }
 0xb2d   :  { %v2362_v27 = vpop.f32.mrb[21].mxu1  ;;  %v1864_v28 = vsel %vm362_vm5, %v1860_v26, -inf }
 0xb2e   :  { %1865 = vmax.xlane.f32.xlu1 %v1864_v28 }
 0xb32   :  { %1517 = vadd.xlane.f32.xlu1 %v1516_v31 }
 0xbbb   :  { %v1866_v32 = vpop.xlane.xlu1 %1865 }
 0xbbc   :  { %v1867_v29 = vsub.f32 %v1860_v26, %v1866_v32 }
 0xbbe   :  { %v1868_v33 = vmul.f32 1.442695, %v1867_v29 }
 0xbbf   :  { %v1518_v36 = vpop.xlane.xlu1 %1517 }
 0xbc0   :  { %2597 = vpow2.f32 %v1868_v33 }
 0xbc1   :  { %2599 = vrcp.f32 %v1518_v36 }
 0xbc2   :  { %2601 = vrcp.f32 %v1695_v38 }
 0xbca   :  { %v2598_v34 = vpop.eup %2597 }
 0xbcb   :  { %2368 = vmatmul.mubr.msk.f32.vlgmr.msra.gmra.mrb[18].mxu0 %vm362_vm5, %v2598_v34  ;;  %v1870_v35 = vsel %vm362_vm5, %v2598_v34, 0.0  ;;  %v2600_v39 = vpop.eup %2599 }
 0xbcc   :  { %1871 = vadd.xlane.f32.xlu1 %v1870_v35  ;;  %2481 = vmatpush3.bf16.msra.mxu0 %v3025_v55  ;;  %v1599_v40 = vmul.f32 %v2600_v39, %v1595_v4  ;;  %v2602_v55 = vpop.eup %2601 }
 0xbcd   :  { %2482 = vmatprep.subr.bf16.mxu0 %v2754_v0  ;;  %2378 = vmatprep.mubr.msk.f32.mxu0 %vm2755_vm0, %v2756_v1  ;;  %v1776_v41 = vmul.f32 %v2602_v55, %v1772_v25 }
 0xbd0   :  { %1344 = vadd.xlane.f32.xlu1 %v1343_v37  ;;  %2484 = vmatpush3.bf16.msra.mxu0 %v3028_v58 }
 0xbe1   :  { %1601 = vrot.lane.b32.xlu1 %v1599_v40, %s2750_s18 }
 0xbe5   :  { %1778 = vrot.lane.b32.xlu1 %v1776_v41, %s2764_s1 }
 0xc59   :  { %v1872_v0 = vpop.xlane.xlu1 %1871 }
 0xc5d   :  { %v1345_v1 = vpop.xlane.xlu1 %1344 }
 0xc5e   :  { %2603 = vrcp.f32 %v1345_v1 }
 0xc5f   :  { %2605 = vrcp.f32 %v1872_v0 }
 0xc61   :  { %v1602_v30 = vpop.permute.xlu1 %1601 }
 0xc65   :  { %v1779_v58 = vpop.permute.xlu1 %1778 }
 0xc68   :  { %v2604_v42 = vpop.eup %2603 }
 0xc69   :  { %v1426_v43 = vmul.f32 %v2604_v42, %v3110_v2  ;;  %v2606_v44 = vpop.eup %2605 }
 0xc6b   :  { %1427 = vst.msk [vmem:[#allocation2] sm:$0xff] %vm282_vm3, %v1426_v43 }
 0xc6c   :  { %1604 = vst.msk [vmem:[#allocation2] sm:$0xff] %vm630_vm6, %v1602_v30 }
 0xc6d   :  { %1781 = vst.msk [vmem:[#allocation2] sm:$0xff] %vm808_vm7, %v1779_v58 }
 0xc9e   :  { %v1949_v45 = vpop.f32.mrb[18].mxu0 }
 0xc9f   :  { %v1953_v46 = vmul.f32 %v2606_v44, %v1949_v45  ;;  %v2369_v47 = vpop.f32.mrb[19].mxu0 }
 0xca1   :  { %1955 = vrot.lane.b32.xlu1 %v1953_v46, %s2765_s28 }
 0xd13   :  { %v1956_v48 = vpop.permute.xlu1 %1955 }
 0xd14   :  { %1958 = vst.msk [vmem:[#allocation2] sm:$0xff] %vm986_vm8, %v1956_v48 }
 0xd1b   :  { %v1959_v49 = vld [vmem:[#allocation2] sm:$0xff] }
 0xd1c   :  { %2379 = vmatmul.mubr.msk.f32.vlgmr.msra.gmra.mrb[20].mxu0 %vm112_vm2, %v1959_v49 }
 0xdef   :  { %v2040_v50 = vpop.f32.mrb[20].mxu0 }
 0xdf0   :  { %v2041_v51 = vadd.f32 %v3056_v9, %v2040_v50  ;;  %v2380_v52 = vpop.f32.mrb[21].mxu0 }
 0xdf2   :  { %2045 = vst.msk [vmem:[#allocation12 + $0x8] sm:$0xff] %vm112_vm2, %v2041_v51 }
 0xdf3   :  { %2728 = shalt.err (!%p2725_p2)
}
 0xdf4   :  { %s2729_s15 = scalar_lea.hbm %s3168_s8, 256 }
 0xdf5   :  { %p2730_p3 = scmp.ne.s32.totalorder %s3168_s8, %s2729_s15  ;;  %p2733_p4 = scmp.lt.u32.totalorder %s2729_s15, %s3168_s8 }
 0xdf7   :  { %p2735_p5 = pnand %p2733_p4, %p2730_p3 }
 0xdf9   :  { %2738 = shalt.err (!%p2735_p5)
}
 0xdfa   :  { %2057 = dma.vmem_to_hbm [thread:$0]  %s2052_s10, 256, %s3168_s8, [#allocation5], %s2749_s17, %s2749_s17, %s2750_s18  }
 0xdfb   :  { %2745 = dma.done.wait [#allocation5], 256  }
 0xdfc   :  { %2746 = vsyncadd [#allocation5], 4294967040 }
 0xdfd   :  { %2061 = vsyncpa [#allocation4], 1 }
 0xdfe   :  { %2062 = vsyncpa [#allocation7], 1 }
 0xdff   :  { %2063 = vsyncpa [#allocation10], 1 }
 0xe00   :  { %2064 = vsyncpa [#allocation5], 1 }

</bundles_post_ra>
